<compile_context>
chip_gen: v6e
topology: v6e:2x2x1
jax: 0.10.0
libtpu: 0.0.40
codegen_flags: <defaults>
</compile_context>

<pallas_src>
import functools

import jax
import jax.numpy as jnp
from jax import lax
from jax.experimental import pallas as pl
from jax.experimental.pallas import tpu as pltpu


def _round_up(x, m):
    return (x + m - 1) // m * m


def _speech_block_kernel(x_ref, w1_ref, bn_ref, w2_ref, out_ref, mid_ref,
                         *, width, pad, t_valid):
    """One (n, t) tile.

    x_ref   : (t_pad + 4*pad, Cp) compute dtype; padded-x row for batch n
              (zero outside the original [0, t_valid) rows / [0, C) channels).
    w*_ref  : (width, Cp, Cp)     compute dtype, layout [k, c_in, c_out]
    bn_ref  : (8, Cp)             f32; rows 0..3 = scale1, bias1, scale2, bias2
    out_ref : (tt, Cp)            output dtype (original rows [t0, t0+tt))
    mid_ref : (tt + 2*pad, Cp)    compute-dtype VMEM scratch (conv1 out + conv2 halo)
    """
    tt = out_ref.shape[0]
    tm = tt + 2 * pad
    t0 = pl.multiple_of(pl.program_id(1) * tt, 8)

    s1 = bn_ref[0:1, :]
    b1 = bn_ref[1:2, :]
    s2 = bn_ref[2:3, :]
    b2 = bn_ref[3:4, :]

    # ---- conv1: `width` shifted MXU matmuls, back-to-back f32 accumulation.
    # Output rows are original rows [t0 - pad, t0 + tt + pad) (conv2's input incl.
    # halo); tap k reads padded-x rows [t0 + k, t0 + k + tm). ----
    acc = jnp.dot(x_ref[pl.ds(t0, tm), :], w1_ref[0],
                  preferred_element_type=jnp.float32)
    for k in range(1, width):
        acc += jnp.dot(x_ref[pl.ds(t0 + k, tm), :], w1_ref[k],
                       preferred_element_type=jnp.float32)

    # ---- bn1 + relu (f32). Rows outside [0, t_valid) must be zeroed (this is
    # exactly conv2's zero padding); only edge tiles pay for the mask. ----
    mid = jnp.maximum(acc * s1 + b1, 0.0)
    row0 = t0 - pad                              # original row index of mid[0]
    interior = (row0 >= 0) & (row0 + tm <= t_valid)

    @pl.when(interior)
    def _():
        mid_ref[...] = mid.astype(mid_ref.dtype)

    @pl.when(jnp.logical_not(interior))
    def _():
        row = row0 + lax.broadcasted_iota(jnp.int32, (tm, 1), 0)
        mid_ref[...] = jnp.where((row >= 0) & (row < t_valid),
                                 mid, 0.0).astype(mid_ref.dtype)

    # ---- conv2: same structure over the mid scratch (static slices). ----
    acc2 = jnp.dot(mid_ref[0:tt, :], w2_ref[0],
                   preferred_element_type=jnp.float32)
    for k in range(1, width):
        acc2 += jnp.dot(mid_ref[k:k + tt, :], w2_ref[k],
                        preferred_element_type=jnp.float32)

    # ---- bn2 + residual + relu (f32); residual sliced from the resident x row. ----
    resid = x_ref[pl.ds(t0 + 2 * pad, tt), :].astype(jnp.float32)
    out = jnp.maximum(acc2 * s2 + b2 + resid, 0.0)

    is_tail = t0 + tt > t_valid

    @pl.when(jnp.logical_not(is_tail))
    def _():
        out_ref[...] = out.astype(out_ref.dtype)

    @pl.when(is_tail)
    def _():
        # Zero rows >= t_valid so the padded output is directly chainable.
        row = t0 + lax.broadcasted_iota(jnp.int32, (tt, 1), 0)
        out_ref[...] = jnp.where(row < t_valid, out, 0.0).astype(out_ref.dtype)


def speech_basic_block_pallas_ntc(x_ntc, params, *, width=9, t_tile=512,
                                  compute_dtype=jnp.bfloat16,
                                  return_padded=False):
    """Channels-last entry point: x_ntc is (N, T, C); returns (N, T, C).

    With return_padded=True the raw (N, t_pad, Cp) kernel output is returned
    (tail rows / pad channels are zero), so stacked blocks can chain without a
    per-block HBM slice + re-pad.  Use compute_dtype=jnp.float32 for strict parity
    with fp32 PyTorch inference (the residual is taken from the compute-dtype x).
    """
    assert width % 2 == 1, "kernel supports odd conv widths (pad = (width-1)//2) only"
    N, T, C = x_ntc.shape
    out_dtype = x_ntc.dtype
    pad = (width - 1) // 2

    cp = max(_round_up(C, 128), 128)          # lane-dense channel dim
    tt = _round_up(min(t_tile, T), 8)         # sublane-aligned T tile
    if N == 1 and T >= 16:
        # Keep >= 2 T tiles so both v7x TensorCores get work when batch == 1.
        tt = min(tt, _round_up(pl.cdiv(T, 2), 8))
    nt = pl.cdiv(T, tt)
    t_pad = nt * tt
    t_row = t_pad + 4 * pad                   # padded-x rows held resident per batch
    tm = tt + 2 * pad                         # conv1 rows per tile

    # ---- pad input once (channels to Cp, T by 2*pad on each side plus tile
    # rounding).  No overlapping halo windows are materialized in HBM. ----
    x_padded = jnp.pad(x_ntc.astype(compute_dtype),
                       ((0, 0), (2 * pad, t_pad - T + 2 * pad), (0, cp - C)))

    # ---- pad / cast parameters (pre-pad once offline in a real model). ----
    dc = cp - C
    w1 = jnp.pad(params["w1"], ((0, 0), (0, dc), (0, dc))).astype(compute_dtype)
    w2 = jnp.pad(params["w2"], ((0, 0), (0, dc), (0, dc))).astype(compute_dtype)

    def _padc(v):
        return jnp.pad(v.astype(jnp.float32), (0, dc))

    bn = jnp.pad(jnp.stack([_padc(params["scale1"]), _padc(params["bias1"]),
                            _padc(params["scale2"]), _padc(params["bias2"])]),
                 ((0, 4), (0, 0)))            # (8, cp), sublane-aligned

    kernel = functools.partial(_speech_block_kernel, width=width, pad=pad, t_valid=T)

    in_it = jnp.dtype(compute_dtype).itemsize
    out_it = jnp.dtype(out_dtype).itemsize
    w_bytes_each = width * cp * cp * in_it

    # Single-buffer the weight streams when they are large (constant index_map, so
    # a second buffer buys nothing); keeps Cp=1024 within v7x's 64 MiB VMEM.
    single_buf_w = 2 * w_bytes_each > (8 << 20)

    def _w_spec():
        if single_buf_w:
            try:
                return pl.BlockSpec((width, cp, cp), lambda n, t: (0, 0, 0),
                                    pipeline_mode=pl.Buffered(1))
            except (TypeError, AttributeError):   # older jax without pipeline_mode
                pass
        return pl.BlockSpec((width, cp, cp), lambda n, t: (0, 0, 0))

    w_buf = 1 if single_buf_w else 2
    vmem_needed = (2 * t_row * cp * in_it      # resident padded x row (double-buf)
                   + 2 * w_buf * w_bytes_each  # w1 + w2
                   + 2 * tt * cp * out_it      # output tile (double-buf)
                   + tm * cp * in_it           # mid scratch
                   + 2 * 8 * cp * 4)           # packed BN params
    try:
        phys_vmem = getattr(pltpu.get_tpu_info(), "vmem_capacity_bytes",
                            128 * 1024 * 1024)
    except Exception:                          # interpret mode / exotic backends
        phys_vmem = 128 * 1024 * 1024
    vmem_cap = int(phys_vmem * 0.85)           # leave Mosaic internal headroom
    vmem_limit = int(min(max(int(1.3 * vmem_needed), 32 * 1024 * 1024), vmem_cap))

    cost = pl.CostEstimate(
        flops=2 * width * cp * cp * N * (nt * tm + t_pad),
        transcendentals=0,
        bytes_accessed=(N * t_row * cp * in_it + N * t_pad * cp * out_it
                        + 2 * w_bytes_each + 8 * cp * 4))

    out = pl.pallas_call(
        kernel,
        out_shape=jax.ShapeDtypeStruct((N, t_pad, cp), out_dtype),
        grid_spec=pltpu.PrefetchScalarGridSpec(
            num_scalar_prefetch=0,
            grid=(N, nt),
            in_specs=[
                # Full padded row per batch; index map ignores t, so it is fetched
                # once per (core, batch) and stays resident across the T tiles.
                pl.BlockSpec((None, t_row, cp), lambda n, t: (n, 0, 0)),
                _w_spec(),                                    # w1
                pl.BlockSpec((8, cp), lambda n, t: (0, 0)),   # packed BN params
                _w_spec(),                                    # w2
            ],
            out_specs=pl.BlockSpec((None, tt, cp), lambda n, t: (n, t, 0)),
            scratch_shapes=[pltpu.VMEM((tm, cp), compute_dtype)],
        ),
        compiler_params=pltpu.CompilerParams(
            dimension_semantics=("parallel", "parallel"),
            vmem_limit_bytes=vmem_limit),
        cost_estimate=cost,
    )(x_padded, w1, bn, w2)

    if return_padded:
        return out
    return out[:, :T, :C]


def speech_basic_block_pallas(x_nchw, params, *, width=9, t_tile=512,
                              compute_dtype=jnp.bfloat16):
    """x_nchw: (N, C, 1, T). Returns (N, C, 1, T)."""
    N, C, H, T = x_nchw.shape
    assert H == 1, "SpeechBasicBlock uses (1, width) kernels; expects H == 1"
    x_ntc = jnp.transpose(x_nchw[:, :, 0, :], (0, 2, 1))
    out_ntc = speech_basic_block_pallas_ntc(
        x_ntc, params, width=width, t_tile=t_tile, compute_dtype=compute_dtype)
    return jnp.transpose(out_ntc, (0, 2, 1))[:, :, None, :]


def _fold_bn(gamma, beta, running_mean, running_var, eps=1e-5):
    scale = gamma / jnp.sqrt(running_var + eps)
    bias = beta - running_mean * scale
    return scale, bias


def make_params(key, channels, width=9):
    """Deterministic synthetic parameters matching the module's __init__ shapes."""
    ks = jax.random.split(key, 8)
    C = channels
    # PyTorch conv weight shape: (out, in, 1, width)
    w1_oihw = jax.random.normal(ks[0], (C, C, 1, width), jnp.float32) * 0.1
    w2_oihw = jax.random.normal(ks[1], (C, C, 1, width), jnp.float32) * 0.1
    gamma1 = 1.0 + 0.1 * jax.random.normal(ks[2], (C,), jnp.float32)
    beta1 = 0.1 * jax.random.normal(ks[3], (C,), jnp.float32)
    mean1 = 0.05 * jax.random.normal(ks[4], (C,), jnp.float32)
    var1 = 0.5 + jnp.abs(jax.random.normal(ks[5], (C,), jnp.float32))
    gamma2 = 1.0 + 0.1 * jax.random.normal(ks[6], (C,), jnp.float32)
    beta2 = 0.1 * jax.random.normal(ks[7], (C,), jnp.float32)
    mean2 = jnp.zeros((C,), jnp.float32)
    var2 = jnp.ones((C,), jnp.float32)

    s1, b1 = _fold_bn(gamma1, beta1, mean1, var1)
    s2, b2 = _fold_bn(gamma2, beta2, mean2, var2)

    # Kernel layout: w[k, c_in, c_out]
    w1_k = jnp.transpose(w1_oihw[:, :, 0, :], (2, 1, 0))
    w2_k = jnp.transpose(w2_oihw[:, :, 0, :], (2, 1, 0))

    kernel_params = {"w1": w1_k, "scale1": s1, "bias1": b1,
                     "w2": w2_k, "scale2": s2, "bias2": b2}
    torch_like = {"w1_oihw": w1_oihw, "w2_oihw": w2_oihw,
                  "s1": s1, "b1": b1, "s2": s2, "b2": b2}
    return kernel_params, torch_like


def reference_forward(x_nchw, tp, *, width=9):
    """Pure-JAX reference mirroring the PyTorch forward (eval-mode BN)."""
    pad = (width - 1) // 2
    dn = ("NCHW", "OIHW", "NCHW")

    def conv(x, w):
        return lax.conv_general_dilated(
            x, w, window_strides=(1, 1),
            padding=((0, 0), (pad, pad)), dimension_numbers=dn)

    out = conv(x_nchw, tp["w1_oihw"])
    out = out * tp["s1"][None, :, None, None] + tp["b1"][None, :, None, None]
    out = jnp.maximum(out, 0.0)
    out = conv(out, tp["w2_oihw"])
    out = out * tp["s2"][None, :, None, None] + tp["b2"][None, :, None, None]
    out = out + x_nchw
    return jnp.maximum(out, 0.0)


if __name__ == "__main__":
    key = jax.random.PRNGKey(0)
    k_x, k_p = jax.random.split(key)

    N, C, T, WIDTH = 2, 16, 50, 9
    x = jax.random.normal(k_x, (N, C, 1, T), jnp.float32)
    kernel_params, torch_like = make_params(k_p, C, width=WIDTH)
    ref = reference_forward(x, torch_like, width=WIDTH)

    # f32 compute path (strict numerics), small T tile so several tiles, both
    # boundary-mask branches and the padded-output tail zeroing are exercised.
    x_ntc = jnp.transpose(x[:, :, 0, :], (0, 2, 1))
    fwd_f32 = jax.jit(functools.partial(
        speech_basic_block_pallas_ntc, width=WIDTH, t_tile=16,
        compute_dtype=jnp.float32, return_padded=True))
    out_pad = jax.block_until_ready(fwd_f32(x_ntc, kernel_params))
    ref_ntc = jnp.transpose(ref[:, :, 0, :], (0, 2, 1))
    assert out_pad.shape[0] == N and out_pad.shape[1] >= T and out_pad.shape[2] >= C
    err = float(jnp.max(jnp.abs(out_pad[:, :T, :C] - ref_ntc)))
    assert jnp.allclose(out_pad[:, :T, :C], ref_ntc, atol=5e-4, rtol=5e-4), err
    # Padded tail rows / channels are zeroed in-kernel (safe for block chaining).
    assert float(jnp.max(jnp.abs(out_pad[:, T:, :]))) == 0.0
    assert float(jnp.max(jnp.abs(out_pad[:, :, C:]))) == 0.0

    # Default bf16 compute path (MXU-native) through the NCHW wrapper.  Compare
    # against the reference evaluated on bf16-rounded inputs / weights.
    fwd_bf16 = jax.jit(functools.partial(speech_basic_block_pallas, width=WIDTH,
                                         compute_dtype=jnp.bfloat16))
    out_bf16 = jax.block_until_ready(fwd_bf16(x, kernel_params))
    rnd = lambda a: a.astype(jnp.bfloat16).astype(jnp.float32)
    tl_r = dict(torch_like)
    tl_r["w1_oihw"] = rnd(torch_like["w1_oihw"])
    tl_r["w2_oihw"] = rnd(torch_like["w2_oihw"])
    ref_bf16 = reference_forward(rnd(x), tl_r, width=WIDTH)
    assert out_bf16.shape == (N, C, 1, T)
    assert jnp.allclose(out_bf16, ref_bf16, atol=5e-2, rtol=5e-2), (
        float(jnp.max(jnp.abs(out_bf16 - ref_bf16))))

    print("KERNEL_OK")
</pallas_src>

<mosaic_0001>
module attributes {stable_mosaic.version = 11 : i64} {
  func.func @_speech_block_kernel(%arg0: i32, %arg1: i32, %arg2: memref<1x80x128xf32, #tpu.memory_space<vmem>>, %arg3: memref<9x128x128xf32, #tpu.memory_space<vmem>>, %arg4: memref<8x128xf32, #tpu.memory_space<vmem>>, %arg5: memref<9x128x128xf32, #tpu.memory_space<vmem>>, %arg6: memref<1x16x128xf32, #tpu.memory_space<vmem>>, %arg7: memref<24x128xf32, #tpu.memory_space<vmem>>) attributes {dimension_semantics = [#tpu.dimension_semantics<parallel>, #tpu.dimension_semantics<parallel>], iteration_bounds = array<i64: 2, 4>, scalar_prefetch = 0 : i64, scratch_operands = 1 : i64, tpu.core_type = #tpu.core_type<tc>, window_params = [{transform_indices = @transform_0, window_bounds = array<i64: 1, 80, 128>}, {pipeline_mode = #tpu.pipeline_mode<synchronous>, transform_indices = @transform_1, window_bounds = array<i64: 9, 128, 128>}, {pipeline_mode = #tpu.pipeline_mode<synchronous>, transform_indices = @transform_2, window_bounds = array<i64: 8, 128>}, {pipeline_mode = #tpu.pipeline_mode<synchronous>, transform_indices = @transform_3, window_bounds = array<i64: 9, 128, 128>}, {transform_indices = @transform_4, window_bounds = array<i64: 1, 16, 128>}]} {
    %c16_i32 = arith.constant 16 : i32
    %0 = arith.muli %arg1, %c16_i32 : i32
    %1 = tpu.assume_multiple %0, 8 : i32
    %c0 = arith.constant 0 : index
    %c0_0 = arith.constant 0 : index
    %2 = vector.load %arg4[%c0, %c0_0] : memref<8x128xf32, #tpu.memory_space<vmem>>, vector<1x128xf32>
    %c1 = arith.constant 1 : index
    %c0_1 = arith.constant 0 : index
    %3 = vector.load %arg4[%c1, %c0_1] : memref<8x128xf32, #tpu.memory_space<vmem>>, vector<1x128xf32>
    %c2 = arith.constant 2 : index
    %c0_2 = arith.constant 0 : index
    %4 = vector.load %arg4[%c2, %c0_2] : memref<8x128xf32, #tpu.memory_space<vmem>>, vector<1x128xf32>
    %c3 = arith.constant 3 : index
    %c0_3 = arith.constant 0 : index
    %5 = vector.load %arg4[%c3, %c0_3] : memref<8x128xf32, #tpu.memory_space<vmem>>, vector<1x128xf32>
    %c0_4 = arith.constant 0 : index
    %6 = arith.index_cast %1 : i32 to index
    %c0_5 = arith.constant 0 : index
    %7 = vector.load %arg2[%c0_4, %6, %c0_5] : memref<1x80x128xf32, #tpu.memory_space<vmem>>, vector<1x24x128xf32>
    %8 = vector.shape_cast %7 : vector<1x24x128xf32> to vector<24x128xf32>
    %c0_6 = arith.constant 0 : index
    %c0_7 = arith.constant 0 : index
    %c0_8 = arith.constant 0 : index
    %9 = vector.load %arg3[%c0_6, %c0_7, %c0_8] : memref<9x128x128xf32, #tpu.memory_space<vmem>>, vector<1x128x128xf32>
    %10 = vector.shape_cast %9 : vector<1x128x128xf32> to vector<128x128xf32>
    %cst = arith.constant dense<0.000000e+00> : vector<24x128xf32>
    %11 = tpu.matmul %8, %10, %cst {dimension_numbers = #tpu.dot_dimension_numbers<[1], [0], [0], [1], [0, 0, 1, 1], [], []>} : vector<24x128xf32>, vector<128x128xf32>, vector<24x128xf32> -> vector<24x128xf32>
    %c1_i32 = arith.constant 1 : i32
    %12 = arith.addi %1, %c1_i32 : i32
    %c0_9 = arith.constant 0 : index
    %13 = arith.index_cast %12 : i32 to index
    %c0_10 = arith.constant 0 : index
    %14 = vector.load %arg2[%c0_9, %13, %c0_10] : memref<1x80x128xf32, #tpu.memory_space<vmem>>, vector<1x24x128xf32>
    %15 = vector.shape_cast %14 : vector<1x24x128xf32> to vector<24x128xf32>
    %c1_11 = arith.constant 1 : index
    %c0_12 = arith.constant 0 : index
    %c0_13 = arith.constant 0 : index
    %16 = vector.load %arg3[%c1_11, %c0_12, %c0_13] : memref<9x128x128xf32, #tpu.memory_space<vmem>>, vector<1x128x128xf32>
    %17 = vector.shape_cast %16 : vector<1x128x128xf32> to vector<128x128xf32>
    %cst_14 = arith.constant dense<0.000000e+00> : vector<24x128xf32>
    %18 = tpu.matmul %15, %17, %cst_14 {dimension_numbers = #tpu.dot_dimension_numbers<[1], [0], [0], [1], [0, 0, 1, 1], [], []>} : vector<24x128xf32>, vector<128x128xf32>, vector<24x128xf32> -> vector<24x128xf32>
    %19 = arith.addf %11, %18 : vector<24x128xf32>
    %c2_i32 = arith.constant 2 : i32
    %20 = arith.addi %1, %c2_i32 : i32
    %c0_15 = arith.constant 0 : index
    %21 = arith.index_cast %20 : i32 to index
    %c0_16 = arith.constant 0 : index
    %22 = vector.load %arg2[%c0_15, %21, %c0_16] : memref<1x80x128xf32, #tpu.memory_space<vmem>>, vector<1x24x128xf32>
    %23 = vector.shape_cast %22 : vector<1x24x128xf32> to vector<24x128xf32>
    %c2_17 = arith.constant 2 : index
    %c0_18 = arith.constant 0 : index
    %c0_19 = arith.constant 0 : index
    %24 = vector.load %arg3[%c2_17, %c0_18, %c0_19] : memref<9x128x128xf32, #tpu.memory_space<vmem>>, vector<1x128x128xf32>
    %25 = vector.shape_cast %24 : vector<1x128x128xf32> to vector<128x128xf32>
    %cst_20 = arith.constant dense<0.000000e+00> : vector<24x128xf32>
    %26 = tpu.matmul %23, %25, %cst_20 {dimension_numbers = #tpu.dot_dimension_numbers<[1], [0], [0], [1], [0, 0, 1, 1], [], []>} : vector<24x128xf32>, vector<128x128xf32>, vector<24x128xf32> -> vector<24x128xf32>
    %27 = arith.addf %19, %26 : vector<24x128xf32>
    %c3_i32 = arith.constant 3 : i32
    %28 = arith.addi %1, %c3_i32 : i32
    %c0_21 = arith.constant 0 : index
    %29 = arith.index_cast %28 : i32 to index
    %c0_22 = arith.constant 0 : index
    %30 = vector.load %arg2[%c0_21, %29, %c0_22] : memref<1x80x128xf32, #tpu.memory_space<vmem>>, vector<1x24x128xf32>
    %31 = vector.shape_cast %30 : vector<1x24x128xf32> to vector<24x128xf32>
    %c3_23 = arith.constant 3 : index
    %c0_24 = arith.constant 0 : index
    %c0_25 = arith.constant 0 : index
    %32 = vector.load %arg3[%c3_23, %c0_24, %c0_25] : memref<9x128x128xf32, #tpu.memory_space<vmem>>, vector<1x128x128xf32>
    %33 = vector.shape_cast %32 : vector<1x128x128xf32> to vector<128x128xf32>
    %cst_26 = arith.constant dense<0.000000e+00> : vector<24x128xf32>
    %34 = tpu.matmul %31, %33, %cst_26 {dimension_numbers = #tpu.dot_dimension_numbers<[1], [0], [0], [1], [0, 0, 1, 1], [], []>} : vector<24x128xf32>, vector<128x128xf32>, vector<24x128xf32> -> vector<24x128xf32>
    %35 = arith.addf %27, %34 : vector<24x128xf32>
    %c4_i32 = arith.constant 4 : i32
    %36 = arith.addi %1, %c4_i32 : i32
    %c0_27 = arith.constant 0 : index
    %37 = arith.index_cast %36 : i32 to index
    %c0_28 = arith.constant 0 : index
    %38 = vector.load %arg2[%c0_27, %37, %c0_28] : memref<1x80x128xf32, #tpu.memory_space<vmem>>, vector<1x24x128xf32>
    %39 = vector.shape_cast %38 : vector<1x24x128xf32> to vector<24x128xf32>
    %c4 = arith.constant 4 : index
    %c0_29 = arith.constant 0 : index
    %c0_30 = arith.constant 0 : index
    %40 = vector.load %arg3[%c4, %c0_29, %c0_30] : memref<9x128x128xf32, #tpu.memory_space<vmem>>, vector<1x128x128xf32>
    %41 = vector.shape_cast %40 : vector<1x128x128xf32> to vector<128x128xf32>
    %cst_31 = arith.constant dense<0.000000e+00> : vector<24x128xf32>
    %42 = tpu.matmul %39, %41, %cst_31 {dimension_numbers = #tpu.dot_dimension_numbers<[1], [0], [0], [1], [0, 0, 1, 1], [], []>} : vector<24x128xf32>, vector<128x128xf32>, vector<24x128xf32> -> vector<24x128xf32>
    %43 = arith.addf %35, %42 : vector<24x128xf32>
    %c5_i32 = arith.constant 5 : i32
    %44 = arith.addi %1, %c5_i32 : i32
    %c0_32 = arith.constant 0 : index
    %45 = arith.index_cast %44 : i32 to index
    %c0_33 = arith.constant 0 : index
    %46 = vector.load %arg2[%c0_32, %45, %c0_33] : memref<1x80x128xf32, #tpu.memory_space<vmem>>, vector<1x24x128xf32>
    %47 = vector.shape_cast %46 : vector<1x24x128xf32> to vector<24x128xf32>
    %c5 = arith.constant 5 : index
    %c0_34 = arith.constant 0 : index
    %c0_35 = arith.constant 0 : index
    %48 = vector.load %arg3[%c5, %c0_34, %c0_35] : memref<9x128x128xf32, #tpu.memory_space<vmem>>, vector<1x128x128xf32>
    %49 = vector.shape_cast %48 : vector<1x128x128xf32> to vector<128x128xf32>
    %cst_36 = arith.constant dense<0.000000e+00> : vector<24x128xf32>
    %50 = tpu.matmul %47, %49, %cst_36 {dimension_numbers = #tpu.dot_dimension_numbers<[1], [0], [0], [1], [0, 0, 1, 1], [], []>} : vector<24x128xf32>, vector<128x128xf32>, vector<24x128xf32> -> vector<24x128xf32>
    %51 = arith.addf %43, %50 : vector<24x128xf32>
    %c6_i32 = arith.constant 6 : i32
    %52 = arith.addi %1, %c6_i32 : i32
    %c0_37 = arith.constant 0 : index
    %53 = arith.index_cast %52 : i32 to index
    %c0_38 = arith.constant 0 : index
    %54 = vector.load %arg2[%c0_37, %53, %c0_38] : memref<1x80x128xf32, #tpu.memory_space<vmem>>, vector<1x24x128xf32>
    %55 = vector.shape_cast %54 : vector<1x24x128xf32> to vector<24x128xf32>
    %c6 = arith.constant 6 : index
    %c0_39 = arith.constant 0 : index
    %c0_40 = arith.constant 0 : index
    %56 = vector.load %arg3[%c6, %c0_39, %c0_40] : memref<9x128x128xf32, #tpu.memory_space<vmem>>, vector<1x128x128xf32>
    %57 = vector.shape_cast %56 : vector<1x128x128xf32> to vector<128x128xf32>
    %cst_41 = arith.constant dense<0.000000e+00> : vector<24x128xf32>
    %58 = tpu.matmul %55, %57, %cst_41 {dimension_numbers = #tpu.dot_dimension_numbers<[1], [0], [0], [1], [0, 0, 1, 1], [], []>} : vector<24x128xf32>, vector<128x128xf32>, vector<24x128xf32> -> vector<24x128xf32>
    %59 = arith.addf %51, %58 : vector<24x128xf32>
    %c7_i32 = arith.constant 7 : i32
    %60 = arith.addi %1, %c7_i32 : i32
    %c0_42 = arith.constant 0 : index
    %61 = arith.index_cast %60 : i32 to index
    %c0_43 = arith.constant 0 : index
    %62 = vector.load %arg2[%c0_42, %61, %c0_43] : memref<1x80x128xf32, #tpu.memory_space<vmem>>, vector<1x24x128xf32>
    %63 = vector.shape_cast %62 : vector<1x24x128xf32> to vector<24x128xf32>
    %c7 = arith.constant 7 : index
    %c0_44 = arith.constant 0 : index
    %c0_45 = arith.constant 0 : index
    %64 = vector.load %arg3[%c7, %c0_44, %c0_45] : memref<9x128x128xf32, #tpu.memory_space<vmem>>, vector<1x128x128xf32>
    %65 = vector.shape_cast %64 : vector<1x128x128xf32> to vector<128x128xf32>
    %cst_46 = arith.constant dense<0.000000e+00> : vector<24x128xf32>
    %66 = tpu.matmul %63, %65, %cst_46 {dimension_numbers = #tpu.dot_dimension_numbers<[1], [0], [0], [1], [0, 0, 1, 1], [], []>} : vector<24x128xf32>, vector<128x128xf32>, vector<24x128xf32> -> vector<24x128xf32>
    %67 = arith.addf %59, %66 : vector<24x128xf32>
    %c8_i32 = arith.constant 8 : i32
    %68 = arith.addi %1, %c8_i32 : i32
    %c0_47 = arith.constant 0 : index
    %69 = arith.index_cast %68 : i32 to index
    %c0_48 = arith.constant 0 : index
    %70 = vector.load %arg2[%c0_47, %69, %c0_48] : memref<1x80x128xf32, #tpu.memory_space<vmem>>, vector<1x24x128xf32>
    %71 = vector.shape_cast %70 : vector<1x24x128xf32> to vector<24x128xf32>
    %c8 = arith.constant 8 : index
    %c0_49 = arith.constant 0 : index
    %c0_50 = arith.constant 0 : index
    %72 = vector.load %arg3[%c8, %c0_49, %c0_50] : memref<9x128x128xf32, #tpu.memory_space<vmem>>, vector<1x128x128xf32>
    %73 = vector.shape_cast %72 : vector<1x128x128xf32> to vector<128x128xf32>
    %cst_51 = arith.constant dense<0.000000e+00> : vector<24x128xf32>
    %74 = tpu.matmul %71, %73, %cst_51 {dimension_numbers = #tpu.dot_dimension_numbers<[1], [0], [0], [1], [0, 0, 1, 1], [], []>} : vector<24x128xf32>, vector<128x128xf32>, vector<24x128xf32> -> vector<24x128xf32>
    %75 = arith.addf %67, %74 : vector<24x128xf32>
    %76 = vector.broadcast %2 : vector<1x128xf32> to vector<24x128xf32>
    %77 = arith.mulf %75, %76 : vector<24x128xf32>
    %78 = vector.broadcast %3 : vector<1x128xf32> to vector<24x128xf32>
    %79 = arith.addf %77, %78 : vector<24x128xf32>
    %cst_52 = arith.constant 0.000000e+00 : f32
    %80 = vector.broadcast %cst_52 : f32 to vector<24x128xf32>
    %81 = arith.maximumf %79, %80 : vector<24x128xf32>
    %c4_i32_53 = arith.constant 4 : i32
    %82 = arith.subi %1, %c4_i32_53 : i32
    %c0_i32 = arith.constant 0 : i32
    %83 = arith.cmpi sge, %82, %c0_i32 : i32
    %c24_i32 = arith.constant 24 : i32
    %84 = arith.addi %82, %c24_i32 : i32
    %c50_i32 = arith.constant 50 : i32
    %85 = arith.cmpi sle, %84, %c50_i32 : i32
    %86 = arith.andi %83, %85 : i1
    %87 = arith.extui %86 : i1 to i32
    %c0_i32_54 = arith.constant 0 : i32
    %88 = arith.cmpi ne, %87, %c0_i32_54 : i32
    scf.if %88 {
      %c0_119 = arith.constant 0 : index
      %c0_120 = arith.constant 0 : index
      %154 = vector.load %arg7[%c0_119, %c0_120] : memref<24x128xf32, #tpu.memory_space<vmem>>, vector<24x128xf32>
      tpu.vector_store %arg7[%c0_119, %c0_120], %81 {strides = array<i32>} : memref<24x128xf32, #tpu.memory_space<vmem>>, vector<24x128xf32>,
    } else {
    }
    %true = arith.constant true
    %89 = arith.xori %86, %true : i1
    %90 = arith.extui %89 : i1 to i32
    %c0_i32_55 = arith.constant 0 : i32
    %91 = arith.cmpi ne, %90, %c0_i32_55 : i32
    scf.if %91 {
      %154 = tpu.iota {dimensions = array<i32: 0>} : vector<24x1xi32>
      %155 = vector.broadcast %82 : i32 to vector<24x1xi32>
      %156 = arith.addi %155, %154 : vector<24x1xi32>
      %c0_i32_119 = arith.constant 0 : i32
      %157 = vector.broadcast %c0_i32_119 : i32 to vector<24x1xi32>
      %158 = arith.cmpi sge, %156, %157 : vector<24x1xi32>
      %c50_i32_120 = arith.constant 50 : i32
      %159 = vector.broadcast %c50_i32_120 : i32 to vector<24x1xi32>
      %160 = arith.cmpi slt, %156, %159 : vector<24x1xi32>
      %161 = arith.andi %158, %160 : vector<24x1xi1>
      %cst_121 = arith.constant 0.000000e+00 : f32
      %162 = vector.shape_cast %161 : vector<24x1xi1> to vector<24x1xi1>
      %163 = vector.broadcast %162 : vector<24x1xi1> to vector<24x128xi1>
      %164 = vector.broadcast %cst_121 : f32 to vector<24x128xf32>
      %165 = arith.select %163, %81, %164 : vector<24x128xi1>, vector<24x128xf32>
      %c0_122 = arith.constant 0 : index
      %c0_123 = arith.constant 0 : index
      %166 = vector.load %arg7[%c0_122, %c0_123] : memref<24x128xf32, #tpu.memory_space<vmem>>, vector<24x128xf32>
      tpu.vector_store %arg7[%c0_122, %c0_123], %165 {strides = array<i32>} : memref<24x128xf32, #tpu.memory_space<vmem>>, vector<24x128xf32>,
    } else {
    }
    %c0_56 = arith.constant 0 : index
    %c0_57 = arith.constant 0 : index
    %92 = vector.load %arg7[%c0_56, %c0_57] : memref<24x128xf32, #tpu.memory_space<vmem>>, vector<16x128xf32>
    %c0_58 = arith.constant 0 : index
    %c0_59 = arith.constant 0 : index
    %c0_60 = arith.constant 0 : index
    %93 = vector.load %arg5[%c0_58, %c0_59, %c0_60] : memref<9x128x128xf32, #tpu.memory_space<vmem>>, vector<1x128x128xf32>
    %94 = vector.shape_cast %93 : vector<1x128x128xf32> to vector<128x128xf32>
    %cst_61 = arith.constant dense<0.000000e+00> : vector<16x128xf32>
    %95 = tpu.matmul %92, %94, %cst_61 {dimension_numbers = #tpu.dot_dimension_numbers<[1], [0], [0], [1], [0, 0, 1, 1], [], []>} : vector<16x128xf32>, vector<128x128xf32>, vector<16x128xf32> -> vector<16x128xf32>
    %c1_62 = arith.constant 1 : index
    %c0_63 = arith.constant 0 : index
    %96 = vector.load %arg7[%c1_62, %c0_63] : memref<24x128xf32, #tpu.memory_space<vmem>>, vector<16x128xf32>
    %c1_64 = arith.constant 1 : index
    %c0_65 = arith.constant 0 : index
    %c0_66 = arith.constant 0 : index
    %97 = vector.load %arg5[%c1_64, %c0_65, %c0_66] : memref<9x128x128xf32, #tpu.memory_space<vmem>>, vector<1x128x128xf32>
    %98 = vector.shape_cast %97 : vector<1x128x128xf32> to vector<128x128xf32>
    %cst_67 = arith.constant dense<0.000000e+00> : vector<16x128xf32>
    %99 = tpu.matmul %96, %98, %cst_67 {dimension_numbers = #tpu.dot_dimension_numbers<[1], [0], [0], [1], [0, 0, 1, 1], [], []>} : vector<16x128xf32>, vector<128x128xf32>, vector<16x128xf32> -> vector<16x128xf32>
    %100 = arith.addf %95, %99 : vector<16x128xf32>
    %c2_68 = arith.constant 2 : index
    %c0_69 = arith.constant 0 : index
    %101 = vector.load %arg7[%c2_68, %c0_69] : memref<24x128xf32, #tpu.memory_space<vmem>>, vector<16x128xf32>
    %c2_70 = arith.constant 2 : index
    %c0_71 = arith.constant 0 : index
    %c0_72 = arith.constant 0 : index
    %102 = vector.load %arg5[%c2_70, %c0_71, %c0_72] : memref<9x128x128xf32, #tpu.memory_space<vmem>>, vector<1x128x128xf32>
    %103 = vector.shape_cast %102 : vector<1x128x128xf32> to vector<128x128xf32>
    %cst_73 = arith.constant dense<0.000000e+00> : vector<16x128xf32>
    %104 = tpu.matmul %101, %103, %cst_73 {dimension_numbers = #tpu.dot_dimension_numbers<[1], [0], [0], [1], [0, 0, 1, 1], [], []>} : vector<16x128xf32>, vector<128x128xf32>, vector<16x128xf32> -> vector<16x128xf32>
    %105 = arith.addf %100, %104 : vector<16x128xf32>
    %c3_74 = arith.constant 3 : index
    %c0_75 = arith.constant 0 : index
    %106 = vector.load %arg7[%c3_74, %c0_75] : memref<24x128xf32, #tpu.memory_space<vmem>>, vector<16x128xf32>
    %c3_76 = arith.constant 3 : index
    %c0_77 = arith.constant 0 : index
    %c0_78 = arith.constant 0 : index
    %107 = vector.load %arg5[%c3_76, %c0_77, %c0_78] : memref<9x128x128xf32, #tpu.memory_space<vmem>>, vector<1x128x128xf32>
    %108 = vector.shape_cast %107 : vector<1x128x128xf32> to vector<128x128xf32>
    %cst_79 = arith.constant dense<0.000000e+00> : vector<16x128xf32>
    %109 = tpu.matmul %106, %108, %cst_79 {dimension_numbers = #tpu.dot_dimension_numbers<[1], [0], [0], [1], [0, 0, 1, 1], [], []>} : vector<16x128xf32>, vector<128x128xf32>, vector<16x128xf32> -> vector<16x128xf32>
    %110 = arith.addf %105, %109 : vector<16x128xf32>
    %c4_80 = arith.constant 4 : index
    %c0_81 = arith.constant 0 : index
    %111 = vector.load %arg7[%c4_80, %c0_81] : memref<24x128xf32, #tpu.memory_space<vmem>>, vector<16x128xf32>
    %c4_82 = arith.constant 4 : index
    %c0_83 = arith.constant 0 : index
    %c0_84 = arith.constant 0 : index
    %112 = vector.load %arg5[%c4_82, %c0_83, %c0_84] : memref<9x128x128xf32, #tpu.memory_space<vmem>>, vector<1x128x128xf32>
    %113 = vector.shape_cast %112 : vector<1x128x128xf32> to vector<128x128xf32>
    %cst_85 = arith.constant dense<0.000000e+00> : vector<16x128xf32>
    %114 = tpu.matmul %111, %113, %cst_85 {dimension_numbers = #tpu.dot_dimension_numbers<[1], [0], [0], [1], [0, 0, 1, 1], [], []>} : vector<16x128xf32>, vector<128x128xf32>, vector<16x128xf32> -> vector<16x128xf32>
    %115 = arith.addf %110, %114 : vector<16x128xf32>
    %c5_86 = arith.constant 5 : index
    %c0_87 = arith.constant 0 : index
    %116 = vector.load %arg7[%c5_86, %c0_87] : memref<24x128xf32, #tpu.memory_space<vmem>>, vector<16x128xf32>
    %c5_88 = arith.constant 5 : index
    %c0_89 = arith.constant 0 : index
    %c0_90 = arith.constant 0 : index
    %117 = vector.load %arg5[%c5_88, %c0_89, %c0_90] : memref<9x128x128xf32, #tpu.memory_space<vmem>>, vector<1x128x128xf32>
    %118 = vector.shape_cast %117 : vector<1x128x128xf32> to vector<128x128xf32>
    %cst_91 = arith.constant dense<0.000000e+00> : vector<16x128xf32>
    %119 = tpu.matmul %116, %118, %cst_91 {dimension_numbers = #tpu.dot_dimension_numbers<[1], [0], [0], [1], [0, 0, 1, 1], [], []>} : vector<16x128xf32>, vector<128x128xf32>, vector<16x128xf32> -> vector<16x128xf32>
    %120 = arith.addf %115, %119 : vector<16x128xf32>
    %c6_92 = arith.constant 6 : index
    %c0_93 = arith.constant 0 : index
    %121 = vector.load %arg7[%c6_92, %c0_93] : memref<24x128xf32, #tpu.memory_space<vmem>>, vector<16x128xf32>
    %c6_94 = arith.constant 6 : index
    %c0_95 = arith.constant 0 : index
    %c0_96 = arith.constant 0 : index
    %122 = vector.load %arg5[%c6_94, %c0_95, %c0_96] : memref<9x128x128xf32, #tpu.memory_space<vmem>>, vector<1x128x128xf32>
    %123 = vector.shape_cast %122 : vector<1x128x128xf32> to vector<128x128xf32>
    %cst_97 = arith.constant dense<0.000000e+00> : vector<16x128xf32>
    %124 = tpu.matmul %121, %123, %cst_97 {dimension_numbers = #tpu.dot_dimension_numbers<[1], [0], [0], [1], [0, 0, 1, 1], [], []>} : vector<16x128xf32>, vector<128x128xf32>, vector<16x128xf32> -> vector<16x128xf32>
    %125 = arith.addf %120, %124 : vector<16x128xf32>
    %c7_98 = arith.constant 7 : index
    %c0_99 = arith.constant 0 : index
    %126 = vector.load %arg7[%c7_98, %c0_99] : memref<24x128xf32, #tpu.memory_space<vmem>>, vector<16x128xf32>
    %c7_100 = arith.constant 7 : index
    %c0_101 = arith.constant 0 : index
    %c0_102 = arith.constant 0 : index
    %127 = vector.load %arg5[%c7_100, %c0_101, %c0_102] : memref<9x128x128xf32, #tpu.memory_space<vmem>>, vector<1x128x128xf32>
    %128 = vector.shape_cast %127 : vector<1x128x128xf32> to vector<128x128xf32>
    %cst_103 = arith.constant dense<0.000000e+00> : vector<16x128xf32>
    %129 = tpu.matmul %126, %128, %cst_103 {dimension_numbers = #tpu.dot_dimension_numbers<[1], [0], [0], [1], [0, 0, 1, 1], [], []>} : vector<16x128xf32>, vector<128x128xf32>, vector<16x128xf32> -> vector<16x128xf32>
    %130 = arith.addf %125, %129 : vector<16x128xf32>
    %c8_104 = arith.constant 8 : index
    %c0_105 = arith.constant 0 : index
    %131 = vector.load %arg7[%c8_104, %c0_105] : memref<24x128xf32, #tpu.memory_space<vmem>>, vector<16x128xf32>
    %c8_106 = arith.constant 8 : index
    %c0_107 = arith.constant 0 : index
    %c0_108 = arith.constant 0 : index
    %132 = vector.load %arg5[%c8_106, %c0_107, %c0_108] : memref<9x128x128xf32, #tpu.memory_space<vmem>>, vector<1x128x128xf32>
    %133 = vector.shape_cast %132 : vector<1x128x128xf32> to vector<128x128xf32>
    %cst_109 = arith.constant dense<0.000000e+00> : vector<16x128xf32>
    %134 = tpu.matmul %131, %133, %cst_109 {dimension_numbers = #tpu.dot_dimension_numbers<[1], [0], [0], [1], [0, 0, 1, 1], [], []>} : vector<16x128xf32>, vector<128x128xf32>, vector<16x128xf32> -> vector<16x128xf32>
    %135 = arith.addf %130, %134 : vector<16x128xf32>
    %c8_i32_110 = arith.constant 8 : i32
    %136 = arith.addi %1, %c8_i32_110 : i32
    %c0_111 = arith.constant 0 : index
    %137 = arith.index_cast %136 : i32 to index
    %c0_112 = arith.constant 0 : index
    %138 = vector.load %arg2[%c0_111, %137, %c0_112] : memref<1x80x128xf32, #tpu.memory_space<vmem>>, vector<1x16x128xf32>
    %139 = vector.shape_cast %138 : vector<1x16x128xf32> to vector<16x128xf32>
    %140 = vector.broadcast %4 : vector<1x128xf32> to vector<16x128xf32>
    %141 = arith.mulf %135, %140 : vector<16x128xf32>
    %142 = vector.broadcast %5 : vector<1x128xf32> to vector<16x128xf32>
    %143 = arith.addf %141, %142 : vector<16x128xf32>
    %144 = arith.addf %143, %139 : vector<16x128xf32>
    %cst_113 = arith.constant 0.000000e+00 : f32
    %145 = vector.broadcast %cst_113 : f32 to vector<16x128xf32>
    %146 = arith.maximumf %144, %145 : vector<16x128xf32>
    %c16_i32_114 = arith.constant 16 : i32
    %147 = arith.addi %1, %c16_i32_114 : i32
    %c50_i32_115 = arith.constant 50 : i32
    %148 = arith.cmpi sgt, %147, %c50_i32_115 : i32
    %true_116 = arith.constant true
    %149 = arith.xori %148, %true_116 : i1
    %150 = arith.extui %149 : i1 to i32
    %c0_i32_117 = arith.constant 0 : i32
    %151 = arith.cmpi ne, %150, %c0_i32_117 : i32
    scf.if %151 {
      %c0_119 = arith.constant 0 : index
      %c0_120 = arith.constant 0 : index
      %c0_121 = arith.constant 0 : index
      %154 = vector.load %arg6[%c0_119, %c0_120, %c0_121] : memref<1x16x128xf32, #tpu.memory_space<vmem>>, vector<1x16x128xf32>
      %155 = vector.shape_cast %154 : vector<1x16x128xf32> to vector<16x128xf32>
      %156 = vector.shape_cast %146 : vector<16x128xf32> to vector<1x16x128xf32>
      tpu.vector_store %arg6[%c0_119, %c0_120, %c0_121], %156 {strides = array<i32>} : memref<1x16x128xf32, #tpu.memory_space<vmem>>, vector<1x16x128xf32>,
    } else {
    }
    %152 = arith.extui %148 : i1 to i32
    %c0_i32_118 = arith.constant 0 : i32
    %153 = arith.cmpi ne, %152, %c0_i32_118 : i32
    scf.if %153 {
      %154 = tpu.iota {dimensions = array<i32: 0>} : vector<16x1xi32>
      %155 = vector.broadcast %1 : i32 to vector<16x1xi32>
      %156 = arith.addi %155, %154 : vector<16x1xi32>
      %c50_i32_119 = arith.constant 50 : i32
      %157 = vector.broadcast %c50_i32_119 : i32 to vector<16x1xi32>
      %158 = arith.cmpi slt, %156, %157 : vector<16x1xi32>
      %cst_120 = arith.constant 0.000000e+00 : f32
      %159 = vector.shape_cast %158 : vector<16x1xi1> to vector<16x1xi1>
      %160 = vector.broadcast %159 : vector<16x1xi1> to vector<16x128xi1>
      %161 = vector.broadcast %cst_120 : f32 to vector<16x128xf32>
      %162 = arith.select %160, %146, %161 : vector<16x128xi1>, vector<16x128xf32>
      %c0_121 = arith.constant 0 : index
      %c0_122 = arith.constant 0 : index
      %c0_123 = arith.constant 0 : index
      %163 = vector.load %arg6[%c0_121, %c0_122, %c0_123] : memref<1x16x128xf32, #tpu.memory_space<vmem>>, vector<1x16x128xf32>
      %164 = vector.shape_cast %163 : vector<1x16x128xf32> to vector<16x128xf32>
      %165 = vector.shape_cast %162 : vector<16x128xf32> to vector<1x16x128xf32>
      tpu.vector_store %arg6[%c0_121, %c0_122, %c0_123], %165 {strides = array<i32>} : memref<1x16x128xf32, #tpu.memory_space<vmem>>, vector<1x16x128xf32>,
    } else {
    }
    return
  }
  func.func @transform_0(%arg0: i32, %arg1: i32) -> (i32, i32, i32) {
    %c0_i32 = arith.constant 0 : i32
    %c0_i32_0 = arith.constant 0 : i32
    %c0_i32_1 = arith.constant 0 : i32
    return %arg0, %c0_i32, %c0_i32_0 : i32, i32, i32
  }
  func.func @transform_1(%arg0: i32, %arg1: i32) -> (i32, i32, i32) {
    %c0_i32 = arith.constant 0 : i32
    %c0_i32_0 = arith.constant 0 : i32
    %c0_i32_1 = arith.constant 0 : i32
    %c0_i32_2 = arith.constant 0 : i32
    return %c0_i32, %c0_i32_0, %c0_i32_1 : i32, i32, i32
  }
  func.func @transform_2(%arg0: i32, %arg1: i32) -> (i32, i32) {
    %c0_i32 = arith.constant 0 : i32
    %c0_i32_0 = arith.constant 0 : i32
    %c0_i32_1 = arith.constant 0 : i32
    return %c0_i32, %c0_i32_0 : i32, i32
  }
  func.func @transform_3(%arg0: i32, %arg1: i32) -> (i32, i32, i32) {
    %c0_i32 = arith.constant 0 : i32
    %c0_i32_0 = arith.constant 0 : i32
    %c0_i32_1 = arith.constant 0 : i32
    %c0_i32_2 = arith.constant 0 : i32
    return %c0_i32, %c0_i32_0, %c0_i32_1 : i32, i32, i32
  }
  func.func @transform_4(%arg0: i32, %arg1: i32) -> (i32, i32, i32) {
    %c0_i32 = arith.constant 0 : i32
    %c0_i32_0 = arith.constant 0 : i32
    return %arg0, %arg1, %c0_i32 : i32, i32, i32
  }
}

</mosaic_0001>

<bundles_post_ra>
// kernel: speech_basic_block_pallas_ntc.1
= control target key start
LH: loop header
LB: loop body
LE: loop exit
PB: predicated region body
PF: predicated region fallthrough
CT: control target
= control target key end

     0   :  { %9 = vsyncpa [#allocation4], 0  ;;  %s5075_s0 = inlined_call_operand.vmem [shape: f32[2,80,128], index: 0, kind: input, shape index: {}]   ;;  %s5076_s1 = inlined_call_operand.vmem [shape: f32[9,128,128], index: 1, kind: input, shape index: {}]   ;;  %s5077_s2 = inlined_call_operand.vmem [shape: f32[8,128], index: 2, kind: input, shape index: {}]   ;;  %s5078_s3 = inlined_call_operand.vmem [shape: f32[9,128,128], index: 3, kind: input, shape index: {}]   ;;  %s5079_s4 = inlined_call_operand.hbm [shape: f32[2,64,128], index: 4, kind: output, shape index: {}]  }
   0x1   :  { %11 = vsyncpa [#allocation4 + $0x1], 0  ;;  %s3763_s15 = smov 0   ;;  %s3765_s16 = smov 0  }
   0x2   :  { %s3767_s17 = smov 0   ;;  %s3769_s18 = smov 0  }
   0x3   :  { %s3771_s19 = smov 0   ;;  %s3773_s20 = smov 0  }
   0x4   :  { %s3775_s21 = smov 0   ;;  %s3777_s22 = smov 0  }
   0x5 LB: > { %s2235_s23 = sadd.s32 4294967295, %s3731_s22   ;;  %s2236_s24 = sadd.s32 4294967294, %s3731_s22   ;;  %s3731_s22 = sphi %s3777_s22, %s17_s22   ;;  %s3727_s21 = sphi %s3775_s21, %s5097_s21   ;;  %s3723_s20 = sphi %s3773_s20, %s5096_s20   ;;  %s3719_s19 = sphi %s3771_s19, %s5095_s19   ;;  %s3715_s18 = sphi %s3769_s18, %s5094_s18   ;;  %s3711_s17 = sphi %s3767_s17, %s5093_s17   ;;  %s3707_s16 = sphi %s3765_s16, %s5092_s16   ;;  %s3703_s15 = sphi %s3763_s15, %s5091_s15  }
   0x6   : > { %s26_s25 = sadd.s32 1, %s3723_s20  ;;  %s29_s26 = sadd.s32 1, %s3727_s21 }
   0x7   : > { %p27_p0 = scmp.ge.s32.totalorder %s26_s25, 4  ;;  %p137_p1 = scmp.ne.s32.totalorder %s3711_s17, %s3707_s16 }
   0x8   : > { %p138_p2 = scmp.eq.s32.totalorder %s2235_s23, 7  ;;  %p143_p5 = scmp.ne.s32.totalorder %s3707_s16, %s3703_s15 }
   0x9   : > { %s5099_s25 = smov (%p27_p0, %s26_s25), 0  ;;  %s5101_s26 = smov (!%p27_p0, %s29_s26), %s3727_s21 }
   0xa   : > { %s123_s27 = ssub.s32 %s3723_s20, %s5099_s25  ;;  %p3814_p3 = por %p138_p2, %p137_p1 }
   0xb   : > { %p31_p4 = scmp.ge.s32.totalorder %s5101_s26, 2  ;;  %p144_p6 = scmp.eq.s32.totalorder %s2236_s24, 7 }
   0xc   : > { %p2239_p7 = scmp.ge.s32.totalorder %s3731_s22, 1  ;;  %p179_p9 = scmp.lt.s32.totalorder %s3731_s22, 9 }
   0xd   : > { %s5103_s26 = smov (%p31_p4, %s5101_s26), 0  ;;  %p3823_p8 = por %p144_p6, %p143_p5 }
   0xe   : > { %5084 = sst [smem:[#allocation6_spill]] %s5103_s26  ;;  %s122_s30 = ssub.s32 %s3727_s21, %s5103_s26 }
   0xf   : > { %s127_s5 = sadd.s32 1, %s3711_s17  ;;  %s124_s6 = sor.u32 %s123_s27, %s122_s30 }
  0x10   : > { %p180_p10 = pnand %p2239_p7, %p179_p9  ;;  %p125_p11 = scmp.eq.s32.totalorder %s124_s6, 0 }
  0x11   : > { %s5080_s8 = sand.u32 (!%p180_p10), 1, %s3707_s16   ;;  %s3872_s23 = sshll.u32 (!%p180_p10), %s3715_s18, 4 }
  0x12   : > { %s3832_s7 = scalar_select %p125_p11, %s3711_s17, %s127_s5  }
  0x13   : > { %183 = sbr.rel (%p180_p10) target bundleno = 845 (0x34d), region = 36  ;;  %s3847_s13 = sshll.u32 (!%p180_p10), %s5080_s8, 4 }
  0x14   : > { %s5081_s24 = sadd.s32 (!%p180_p10), 4294967292, %s3872_s23  ;;  %s1172_s27 = sadd.s32 (!%p180_p10), 20, %s3872_s23 }
  0x15   : > { %p3886_p12 = scmp.ge.s32.totalorder (!%p180_p10), %s5081_s24, 0  ;;  %p3890_p13 = scmp.le.s32.totalorder (!%p180_p10), %s1172_s27, 50 }
  0x16   : > { %p205_p1 = scmp.lt.s32.totalorder (!%p180_p10), %s3719_s19, 1  ;;  %s4546_s30 = scalar_lea.vmem (!%p180_p10), [#allocation3], %s3847_s13 }
  0x17   : > { %p1174_p0 = pnand (!%p180_p10), %p3890_p13, %p3886_p12 }
  0x18   : > { %v3838_v0 = vld [vmem:[%s5077_s2 + $0x2] ss:$0 sm:$0xff]  ;;  %v3843_v1 = vld [vmem:[%s5077_s2 + $0x3] ss:$0 sm:$0xff]  ;;  %v3733_v2 = vmov 0.0   ;;  %v2262_v3 = vld [vmem:[%s5076_s1 + $0xf8] sm:$0xff] }
  0x19   : > { %2879 = vmatprep.subr.mxu0 %v3733_v2  ;;  %2920 = vmatprep.subr.mxu1 %v3733_v2  ;;  %v235_v4 = vld [vmem:[%s5076_s1 + $0x78] sm:$0xff]  ;;  %v2261_v5 = vld [vmem:[%s5076_s1 + $0xf0] sm:$0xff]  ;;  %v2260_v7 = vld [vmem:[%s5076_s1 + $0xe8] sm:$0xff]  ;;  %s206_s27 = scalar_select %p205_p1, %s3719_s19, 1  ;;  %vm3734_vm0 = vmmov 0  }
  0x1a   : > { %2880 = vmatpush3.msra.mxu0 %v2262_v3  ;;  %2921 = vmatpush3.msra.mxu1 %v235_v4  ;;  %v234_v6 = vld [vmem:[%s5076_s1 + $0x70] sm:$0xff]  ;;  %v233_v8 = vld [vmem:[%s5076_s1 + $0x68] sm:$0xff]  ;;  %v2259_v9 = vld [vmem:[%s5076_s1 + $0xe0] sm:$0xff] }
  0x1b   : > { %2881 = vmatprep.subr.mxu0 %v3733_v2  ;;  %2922 = vmatprep.subr.mxu1 %v3733_v2  ;;  %v232_v10 = vld [vmem:[%s5076_s1 + $0x60] sm:$0xff]  ;;  %v2258_v11 = vld [vmem:[%s5076_s1 + $0xd8] sm:$0xff]  ;;  %v2257_v13 = vld [vmem:[%s5076_s1 + $0xd0] sm:$0xff]  ;;  %s3563_s6 = smul.u32 80, %s206_s27 }
  0x1c   : > { %2882 = vmatpush3.msra.mxu0 %v2261_v5  ;;  %2923 = vmatpush3.msra.mxu1 %v234_v6  ;;  %v231_v12 = vld [vmem:[%s5076_s1 + $0x58] sm:$0xff]  ;;  %v230_v14 = vld [vmem:[%s5076_s1 + $0x50] sm:$0xff]  ;;  %v2256_v15 = vld [vmem:[%s5076_s1 + $0xc8] sm:$0xff] }
  0x1d   : > { %2883 = vmatprep.subr.mxu0 %v3733_v2  ;;  %2924 = vmatprep.subr.mxu1 %v3733_v2  ;;  %v229_v16 = vld [vmem:[%s5076_s1 + $0x48] sm:$0xff]  ;;  %v2255_v17 = vld [vmem:[%s5076_s1 + $0xc0] sm:$0xff]  ;;  %v2254_v19 = vld [vmem:[%s5076_s1 + $0xb8] sm:$0xff]  ;;  %s209_s24 = scalar_lea.vmem %s5075_s0, %s3563_s6 }
  0x1e   : > { %2884 = vmatpush3.msra.mxu0 %v2260_v7  ;;  %2925 = vmatpush3.msra.mxu1 %v233_v8  ;;  %v228_v18 = vld [vmem:[%s5076_s1 + $0x40] sm:$0xff]  ;;  %v227_v20 = vld [vmem:[%s5076_s1 + $0x38] sm:$0xff]  ;;  %v2253_v21 = vld [vmem:[%s5076_s1 + $0xb0] sm:$0xff]  ;;  %s3992_s26 = scalar_lea.vmem %s209_s24, %s3872_s23 }
  0x1f   : > { %2885 = vmatprep.subr.mxu0 %v3733_v2  ;;  %2926 = vmatprep.subr.mxu1 %v3733_v2  ;;  %v226_v22 = vld [vmem:[%s5076_s1 + $0x30] sm:$0xff]  ;;  %v2252_v23 = vld [vmem:[%s5076_s1 + $0xa8] sm:$0xff]  ;;  %v2251_v25 = vld [vmem:[%s5076_s1 + $0xa0] sm:$0xff] }
  0x20   : > { %2886 = vmatpush3.msra.mxu0 %v2259_v9  ;;  %2927 = vmatpush3.msra.mxu1 %v232_v10  ;;  %v225_v24 = vld [vmem:[%s5076_s1 + $0x28] sm:$0xff]  ;;  %v224_v26 = vld [vmem:[%s5076_s1 + $0x20] sm:$0xff]  ;;  %v2250_v27 = vld [vmem:[%s5076_s1 + $0x98] sm:$0xff] }
  0x21   : > { %2887 = vmatprep.subr.mxu0 %v3733_v2  ;;  %2928 = vmatprep.subr.mxu1 %v3733_v2  ;;  %v223_v28 = vld [vmem:[%s5076_s1 + $0x18] sm:$0xff]  ;;  %v2249_v29 = vld [vmem:[%s5076_s1 + $0x90] sm:$0xff]  ;;  %v2248_v31 = vld [vmem:[%s5076_s1 + $0x88] sm:$0xff] }
  0x22   : > { %2888 = vmatpush3.msra.mxu0 %v2258_v11  ;;  %2929 = vmatpush3.msra.mxu1 %v231_v12  ;;  %v222_v30 = vld [vmem:[%s5076_s1 + $0x10] sm:$0xff]  ;;  %v221_v32 = vld [vmem:[%s5076_s1 + $0x8] sm:$0xff]  ;;  %v2247_v33 = vld [vmem:[%s5076_s1 + $0x80] sm:$0xff] }
  0x23   : > { %2889 = vmatprep.subr.mxu0 %v3733_v2  ;;  %2930 = vmatprep.subr.mxu1 %v3733_v2  ;;  %v2244_v34 = vld [vmem:[%s3992_s26 + $0x1] sm:$0xff]  ;;  %v2282_v37 = vld [vmem:[%s5076_s1 + $0x178] sm:$0xff]  ;;  %v2281_v38 = vld [vmem:[%s5076_s1 + $0x170] sm:$0xff] }
  0x24   : > { %2890 = vmatpush3.msra.mxu0 %v2257_v13  ;;  %2931 = vmatpush3.msra.mxu1 %v230_v14  ;;  %v220_v35 = vld [vmem:[%s5076_s1] sm:$0xff]  ;;  %v2302_v39 = vld [vmem:[%s5076_s1 + $0x1f8] sm:$0xff]  ;;  %v2280_v40 = vld [vmem:[%s5076_s1 + $0x168] sm:$0xff] }
  0x25   : > { %2891 = vmatprep.subr.mxu0 %v3733_v2  ;;  %2932 = vmatprep.subr.mxu1 %v3733_v2  ;;  %v217_v36 = vld [vmem:[%s3992_s26] sm:$0xff]  ;;  %v2301_v41 = vld [vmem:[%s5076_s1 + $0x1f0] sm:$0xff]  ;;  %v2300_v43 = vld [vmem:[%s5076_s1 + $0x1e8] sm:$0xff] }
  0x26   : > { %2892 = vmatpush3.msra.mxu0 %v2256_v15  ;;  %2933 = vmatpush3.msra.mxu1 %v229_v16  ;;  %v2279_v42 = vld [vmem:[%s5076_s1 + $0x160] sm:$0xff]  ;;  %v2278_v44 = vld [vmem:[%s5076_s1 + $0x158] sm:$0xff]  ;;  %v2277_v46 = vld [vmem:[%s5076_s1 + $0x150] sm:$0xff] }
  0x27   : > { %2893 = vmatprep.subr.mxu0 %v3733_v2  ;;  %2934 = vmatprep.subr.mxu1 %v3733_v2  ;;  %v2299_v45 = vld [vmem:[%s5076_s1 + $0x1e0] sm:$0xff]  ;;  %v2298_v47 = vld [vmem:[%s5076_s1 + $0x1d8] sm:$0xff]  ;;  %v2276_v48 = vld [vmem:[%s5076_s1 + $0x148] sm:$0xff] }
  0x28   : > { %2894 = vmatpush3.msra.mxu0 %v2255_v17  ;;  %2935 = vmatpush3.msra.mxu1 %v228_v18  ;;  %v2297_v49 = vld [vmem:[%s5076_s1 + $0x1d0] sm:$0xff]  ;;  %v2275_v50 = vld [vmem:[%s5076_s1 + $0x140] sm:$0xff]  ;;  %v2296_v51 = vld [vmem:[%s5076_s1 + $0x1c8] sm:$0xff] }
  0x29   : > { %2895 = vmatprep.subr.mxu0 %v3733_v2  ;;  %2936 = vmatprep.subr.mxu1 %v3733_v2  ;;  %v2274_v52 = vld [vmem:[%s5076_s1 + $0x138] sm:$0xff]  ;;  %v2295_v53 = vld [vmem:[%s5076_s1 + $0x1c0] sm:$0xff]  ;;  %v2273_v54 = vld [vmem:[%s5076_s1 + $0x130] sm:$0xff] }
  0x2a   : > { %2896 = vmatpush3.msra.mxu0 %v2254_v19  ;;  %2937 = vmatpush3.msra.mxu1 %v227_v20  ;;  %v2294_v55 = vld [vmem:[%s5076_s1 + $0x1b8] sm:$0xff]  ;;  %v2272_v56 = vld [vmem:[%s5076_s1 + $0x128] sm:$0xff]  ;;  %v2293_v57 = vld [vmem:[%s5076_s1 + $0x1b0] sm:$0xff] }
  0x2b   : > { %2897 = vmatprep.subr.mxu0 %v3733_v2  ;;  %2938 = vmatprep.subr.mxu1 %v3733_v2  ;;  %v2245_v58 = vld [vmem:[%s3992_s26 + $0x9] sm:$0xff]  ;;  %v2271_v59 = vld [vmem:[%s5076_s1 + $0x120] sm:$0xff]  ;;  %v2270_v62 = vld [vmem:[%s5076_s1 + $0x118] sm:$0xff] }
  0x2c   : > { %2898 = vmatpush3.msra.mxu0 %v2253_v21  ;;  %2939 = vmatpush3.msra.mxu1 %v226_v22  ;;  %v2292_v60 = vld [vmem:[%s5076_s1 + $0x1a8] sm:$0xff]  ;;  %v2291_v63 = vld [vmem:[%s5076_s1 + $0x1a0] sm:$0xff]  ;;  %v2246_v3 = vld [vmem:[%s3992_s26 + $0x11] sm:$0xff] }
  0x2d   : > { %2899 = vmatprep.subr.mxu0 %v3733_v2  ;;  %2940 = vmatprep.subr.mxu1 %v3733_v2  ;;  %v4106_v61 = vld [vmem:[%s3992_s26 + $0x8] sm:$0xff]  ;;  %v2269_v4 = vld [vmem:[%s5076_s1 + $0x110] sm:$0xff]  ;;  %v2290_v5 = vld [vmem:[%s5076_s1 + $0x198] sm:$0xff] }
  0x2e   : > { %2900 = vmatpush3.msra.mxu0 %v2252_v23  ;;  %2941 = vmatpush3.msra.mxu1 %v225_v24  ;;  %v4131_v6 = vld [vmem:[%s3992_s26 + $0x10] sm:$0xff]  ;;  %v2268_v7 = vld [vmem:[%s5076_s1 + $0x108] sm:$0xff]  ;;  %v2267_v9 = vld [vmem:[%s5076_s1 + $0x100] sm:$0xff] }
  0x2f   : > { %2901 = vmatprep.subr.mxu0 %v3733_v2  ;;  %2942 = vmatprep.subr.mxu1 %v3733_v2  ;;  %v2289_v8 = vld [vmem:[%s5076_s1 + $0x190] sm:$0xff]  ;;  %v2288_v10 = vld [vmem:[%s5076_s1 + $0x188] sm:$0xff]  ;;  %v2287_v12 = vld [vmem:[%s5076_s1 + $0x180] sm:$0xff] }
  0x30   : > { %2902 = vmatpush3.msra.mxu0 %v2251_v25  ;;  %2943 = vmatpush3.msra.mxu1 %v224_v26  ;;  %v2264_v11 = vld [vmem:[%s3992_s26 + $0x2] sm:$0xff]  ;;  %v2322_v13 = vld [vmem:[%s5076_s1 + $0x278] sm:$0xff]  ;;  %v2321_v15 = vld [vmem:[%s5076_s1 + $0x270] sm:$0xff] }
  0x31   : > { %2903 = vmatprep.subr.mxu0 %v3733_v2  ;;  %2944 = vmatprep.subr.mxu1 %v3733_v2  ;;  %v2284_v14 = vld [vmem:[%s3992_s26 + $0x3] sm:$0xff]  ;;  %v2342_v16 = vld [vmem:[%s5076_s1 + $0x2f8] sm:$0xff]  ;;  %v2341_v19 = vld [vmem:[%s5076_s1 + $0x2f0] sm:$0xff] }
  0x32   : > { %2904 = vmatpush3.msra.mxu0 %v2250_v27  ;;  %2945 = vmatpush3.msra.mxu1 %v223_v28  ;;  %v2265_v17 = vld [vmem:[%s3992_s26 + $0xa] sm:$0xff]  ;;  %v2319_v21 = vld [vmem:[%s5076_s1 + $0x260] sm:$0xff]  ;;  %v2266_v23 = vld [vmem:[%s3992_s26 + $0x12] sm:$0xff] }
  0x33   : > { %2905 = vmatprep.subr.mxu0 %v3733_v2  ;;  %2946 = vmatprep.subr.mxu1 %v3733_v2  ;;  %v2320_v18 = vld [vmem:[%s5076_s1 + $0x268] sm:$0xff]  ;;  %v2318_v24 = vld [vmem:[%s5076_s1 + $0x258] sm:$0xff]  ;;  %v2339_v25 = vld [vmem:[%s5076_s1 + $0x2e0] sm:$0xff] }
  0x34   : > { %2906 = vmatpush3.msra.mxu0 %v2249_v29  ;;  %2947 = vmatpush3.msra.mxu1 %v222_v30  ;;  %v2285_v20 = vld [vmem:[%s3992_s26 + $0xb] sm:$0xff]  ;;  %v2286_v26 = vld [vmem:[%s3992_s26 + $0x13] sm:$0xff] }
  0x35   : > { %2907 = vmatprep.subr.mxu0 %v3733_v2  ;;  %2948 = vmatprep.subr.mxu1 %v3733_v2  ;;  %v2340_v22 = vld [vmem:[%s5076_s1 + $0x2e8] sm:$0xff]  ;;  %v2317_v27 = vld [vmem:[%s5076_s1 + $0x250] sm:$0xff]  ;;  %v2338_v28 = vld [vmem:[%s5076_s1 + $0x2d8] sm:$0xff] }
  0x36   : > { %2908 = vmatpush3.msra.mxu0 %v2248_v31  ;;  %2949 = vmatpush3.msra.mxu1 %v221_v32  ;;  %v2316_v29 = vld [vmem:[%s5076_s1 + $0x248] sm:$0xff]  ;;  %v2337_v30 = vld [vmem:[%s5076_s1 + $0x2d0] sm:$0xff]  ;;  %v2315_v31 = vld [vmem:[%s5076_s1 + $0x240] sm:$0xff] }
  0x37   : > { %2909 = vmatprep.subr.mxu0 %v3733_v2  ;;  %2911 = vmatprep.mubr.msk.f32.mxu0 %vm3734_vm0, %v3733_v2  ;;  %v2336_v32 = vld [vmem:[%s5076_s1 + $0x2c8] sm:$0xff] }
  0x38   : > { %2910 = vmatpush3.msra.mxu0 %v2247_v33  ;;  %2950 = vmatprep.subr.mxu1 %v3733_v2  ;;  %v2314_v33 = vld [vmem:[%s5076_s1 + $0x238] sm:$0xff] }
  0x39   : > { %2912 = vmatmul.mubr.f32.vlgmr.msra.gmra.mxu0 %v2244_v34  ;;  %2951 = vmatpush3.msra.mxu1 %v220_v35  ;;  %v2335_v34 = vld [vmem:[%s5076_s1 + $0x2c0] sm:$0xff]  ;;  %v2313_v35 = vld [vmem:[%s5076_s1 + $0x230] sm:$0xff] }
  0x3a   : > { %2952 = vmatprep.mubr.msk.f32.mxu1 %vm3734_vm0, %v3733_v2  ;;  %2961 = vmatprep.subr.mxu0 %v3733_v2 }
  0x3b   : > { %2953 = vmatmul.mubr.f32.vlgmr.msra.gmra.mxu1 %v217_v36  ;;  %2962 = vmatpush3.msra.mxu0 %v2282_v37  ;;  %v2334_v36 = vld [vmem:[%s5076_s1 + $0x2b8] sm:$0xff]  ;;  %v2312_v37 = vld [vmem:[%s5076_s1 + $0x228] sm:$0xff] }
  0x3c   : > { %2963 = vmatprep.subr.mxu0 %v3733_v2  ;;  %3002 = vmatprep.subr.mxu1 %v3733_v2 }
  0x3d   : > { %2964 = vmatpush3.msra.mxu0 %v2281_v38  ;;  %3003 = vmatpush3.msra.mxu1 %v2302_v39  ;;  %v2333_v38 = vld [vmem:[%s5076_s1 + $0x2b0] sm:$0xff]  ;;  %v2311_v39 = vld [vmem:[%s5076_s1 + $0x220] sm:$0xff] }
  0x3e   : > { %2965 = vmatprep.subr.mxu0 %v3733_v2  ;;  %3004 = vmatprep.subr.mxu1 %v3733_v2 }
  0x3f   : > { %2966 = vmatpush3.msra.mxu0 %v2280_v40  ;;  %3005 = vmatpush3.msra.mxu1 %v2301_v41  ;;  %v2332_v40 = vld [vmem:[%s5076_s1 + $0x2a8] sm:$0xff]  ;;  %v2310_v41 = vld [vmem:[%s5076_s1 + $0x218] sm:$0xff] }
  0x40   : > { %2967 = vmatprep.subr.mxu0 %v3733_v2  ;;  %3006 = vmatprep.subr.mxu1 %v3733_v2 }
  0x41   : > { %2968 = vmatpush3.msra.mxu0 %v2279_v42  ;;  %3007 = vmatpush3.msra.mxu1 %v2300_v43  ;;  %v2331_v42 = vld [vmem:[%s5076_s1 + $0x2a0] sm:$0xff]  ;;  %v2309_v43 = vld [vmem:[%s5076_s1 + $0x210] sm:$0xff] }
  0x42   : > { %2969 = vmatprep.subr.mxu0 %v3733_v2  ;;  %3008 = vmatprep.subr.mxu1 %v3733_v2 }
  0x43   : > { %2970 = vmatpush3.msra.mxu0 %v2278_v44  ;;  %3009 = vmatpush3.msra.mxu1 %v2299_v45  ;;  %v2330_v44 = vld [vmem:[%s5076_s1 + $0x298] sm:$0xff]  ;;  %v2308_v45 = vld [vmem:[%s5076_s1 + $0x208] sm:$0xff] }
  0x44   : > { %2971 = vmatprep.subr.mxu0 %v3733_v2  ;;  %3010 = vmatprep.subr.mxu1 %v3733_v2 }
  0x45   : > { %2972 = vmatpush3.msra.mxu0 %v2277_v46  ;;  %3011 = vmatpush3.msra.mxu1 %v2298_v47  ;;  %v2329_v46 = vld [vmem:[%s5076_s1 + $0x290] sm:$0xff]  ;;  %v2307_v47 = vld [vmem:[%s5076_s1 + $0x200] sm:$0xff] }
  0x46   : > { %2973 = vmatprep.subr.mxu0 %v3733_v2  ;;  %3012 = vmatprep.subr.mxu1 %v3733_v2 }
  0x47   : > { %2974 = vmatpush3.msra.mxu0 %v2276_v48  ;;  %3013 = vmatpush3.msra.mxu1 %v2297_v49  ;;  %v2328_v48 = vld [vmem:[%s5076_s1 + $0x288] sm:$0xff] }
  0x48   : > { %2975 = vmatprep.subr.mxu0 %v3733_v2  ;;  %3014 = vmatprep.subr.mxu1 %v3733_v2  ;;  %v2304_v49 = vld [vmem:[%s3992_s26 + $0x4] sm:$0xff] }
  0x49   : > { %2976 = vmatpush3.msra.mxu0 %v2275_v50  ;;  %3015 = vmatpush3.msra.mxu1 %v2296_v51  ;;  %v2327_v50 = vld [vmem:[%s5076_s1 + $0x280] sm:$0xff]  ;;  %v2362_v51 = vld [vmem:[%s5076_s1 + $0x378] sm:$0xff] }
  0x4a   : > { %2977 = vmatprep.subr.mxu0 %v3733_v2  ;;  %3016 = vmatprep.subr.mxu1 %v3733_v2 }
  0x4b   : > { %2978 = vmatpush3.msra.mxu0 %v2274_v52  ;;  %3017 = vmatpush3.msra.mxu1 %v2295_v53  ;;  %v2324_v52 = vld [vmem:[%s3992_s26 + $0x5] sm:$0xff]  ;;  %v2361_v53 = vld [vmem:[%s5076_s1 + $0x370] sm:$0xff] }
  0x4c   : > { %2979 = vmatprep.subr.mxu0 %v3733_v2  ;;  %3018 = vmatprep.subr.mxu1 %v3733_v2 }
  0x4d   : > { %2980 = vmatpush3.msra.mxu0 %v2273_v54  ;;  %3019 = vmatpush3.msra.mxu1 %v2294_v55  ;;  %v2382_v54 = vld [vmem:[%s5076_s1 + $0x3f8] sm:$0xff]  ;;  %v2305_v55 = vld [vmem:[%s3992_s26 + $0xc] sm:$0xff] }
  0x4e   : > { %2981 = vmatprep.subr.mxu0 %v3733_v2  ;;  %3020 = vmatprep.subr.mxu1 %v3733_v2 }
  0x4f   : > { %2982 = vmatpush3.msra.mxu0 %v2272_v56  ;;  %3021 = vmatpush3.msra.mxu1 %v2293_v57  ;;  %v2360_v56 = vld [vmem:[%s5076_s1 + $0x368] sm:$0xff]  ;;  %v2381_v57 = vld [vmem:[%s5076_s1 + $0x3f0] sm:$0xff] }
  0x50   : > { %2914 = vmatprep.mubr.msk.f32.mxu0 %vm3734_vm0, %v3733_v2  ;;  %2983 = vmatprep.subr.mxu0 %v3733_v2 }
  0x51   : > { %3022 = vmatprep.subr.mxu1 %v3733_v2  ;;  %2915 = vmatmul.mubr.f32.gmra.mxu0 %v2245_v58  ;;  %v2325_v58 = vld [vmem:[%s3992_s26 + $0xd] sm:$0xff] }
  0x52   : > { %2984 = vmatpush3.msra.mxu0 %v2271_v59  ;;  %3023 = vmatpush3.msra.mxu1 %v2292_v60  ;;  %v2359_v59 = vld [vmem:[%s5076_s1 + $0x360] sm:$0xff]  ;;  %v2380_v60 = vld [vmem:[%s5076_s1 + $0x3e8] sm:$0xff] }
  0x53   : > { %2955 = vmatprep.mubr.msk.f32.mxu1 %vm3734_vm0, %v3733_v2  ;;  %2985 = vmatprep.subr.mxu0 %v3733_v2 }
  0x54   : > { %3024 = vmatprep.subr.mxu1 %v3733_v2  ;;  %2956 = vmatmul.mubr.f32.gmra.mxu1 %v4106_v61 }
  0x55   : > { %2986 = vmatpush3.msra.mxu0 %v2270_v62  ;;  %3025 = vmatpush3.msra.mxu1 %v2291_v63  ;;  %v2306_v62 = vld [vmem:[%s3992_s26 + $0x14] sm:$0xff] }
  0x56   : > { %2917 = vmatprep.mubr.msk.f32.mxu0 %vm3734_vm0, %v3733_v2  ;;  %2987 = vmatprep.subr.mxu0 %v3733_v2  ;;  %v2358_v63 = vld [vmem:[%s5076_s1 + $0x358] sm:$0xff] }
  0x57   : > { %3026 = vmatprep.subr.mxu1 %v3733_v2  ;;  %2918 = vmatmul.mubr.f32.gmra.mxu0 %v2246_v3  ;;  %v2379_v3 = vld [vmem:[%s5076_s1 + $0x3e0] sm:$0xff] }
  0x58   : > { %2988 = vmatpush3.msra.mxu0 %v2269_v4  ;;  %3027 = vmatpush3.msra.mxu1 %v2290_v5  ;;  %v2326_v4 = vld [vmem:[%s3992_s26 + $0x15] sm:$0xff] }
  0x59   : > { %2958 = vmatprep.mubr.msk.f32.mxu1 %vm3734_vm0, %v3733_v2  ;;  %2989 = vmatprep.subr.mxu0 %v3733_v2  ;;  %v2357_v5 = vld [vmem:[%s5076_s1 + $0x350] sm:$0xff] }
  0x5a   : > { %3028 = vmatprep.subr.mxu1 %v3733_v2  ;;  %2959 = vmatmul.mubr.f32.gmra.mxu1 %v4131_v6 }
  0x5b   : > { %2990 = vmatpush3.msra.mxu0 %v2268_v7  ;;  %3029 = vmatpush3.msra.mxu1 %v2289_v8  ;;  %v2378_v7 = vld [vmem:[%s5076_s1 + $0x3d8] sm:$0xff]  ;;  %v2356_v8 = vld [vmem:[%s5076_s1 + $0x348] sm:$0xff] }
  0x5c   : > { %2991 = vmatprep.subr.mxu0 %v3733_v2  ;;  %3030 = vmatprep.subr.mxu1 %v3733_v2 }
  0x5d   : > { %2992 = vmatpush3.msra.mxu0 %v2267_v9  ;;  %2993 = vmatprep.mubr.msk.f32.mxu0 %vm3734_vm0, %v3733_v2  ;;  %v2377_v9 = vld [vmem:[%s5076_s1 + $0x3d0] sm:$0xff] }
  0x5e   : > { %3031 = vmatpush3.msra.mxu1 %v2288_v10  ;;  %2994 = vmatmul.mubr.f32.vlgmr.msra.gmra.mxu0 %v2264_v11  ;;  %v2355_v10 = vld [vmem:[%s5076_s1 + $0x340] sm:$0xff]  ;;  %v2376_v11 = vld [vmem:[%s5076_s1 + $0x3c8] sm:$0xff] }
  0x5f   : > { %3032 = vmatprep.subr.mxu1 %v3733_v2  ;;  %3043 = vmatprep.subr.mxu0 %v3733_v2 }
  0x60   : > { %3033 = vmatpush3.msra.mxu1 %v2287_v12  ;;  %3034 = vmatprep.mubr.msk.f32.mxu1 %vm3734_vm0, %v3733_v2  ;;  %v2354_v12 = vld [vmem:[%s5076_s1 + $0x338] sm:$0xff] }
  0x61   : > { %3044 = vmatpush3.msra.mxu0 %v2322_v13  ;;  %3035 = vmatmul.mubr.f32.vlgmr.msra.gmra.mxu1 %v2284_v14  ;;  %v2375_v13 = vld [vmem:[%s5076_s1 + $0x3c0] sm:$0xff]  ;;  %v2353_v14 = vld [vmem:[%s5076_s1 + $0x330] sm:$0xff] }
  0x62   : > { %3045 = vmatprep.subr.mxu0 %v3733_v2  ;;  %3084 = vmatprep.subr.mxu1 %v3733_v2 }
  0x63   : > { %2996 = vmatprep.mubr.msk.f32.mxu0 %vm3734_vm0, %v3733_v2  ;;  %3046 = vmatpush3.msra.mxu0 %v2321_v15  ;;  %v2374_v15 = vld [vmem:[%s5076_s1 + $0x3b8] sm:$0xff] }
  0x64   : > { %3085 = vmatpush3.msra.mxu1 %v2342_v16  ;;  %2997 = vmatmul.mubr.f32.gmra.mxu0 %v2265_v17  ;;  %v2352_v16 = vld [vmem:[%s5076_s1 + $0x328] sm:$0xff]  ;;  %v2373_v17 = vld [vmem:[%s5076_s1 + $0x3b0] sm:$0xff] }
  0x65   : > { %3047 = vmatprep.subr.mxu0 %v3733_v2  ;;  %3086 = vmatprep.subr.mxu1 %v3733_v2 }
  0x66   : > { %3037 = vmatprep.mubr.msk.f32.mxu1 %vm3734_vm0, %v3733_v2  ;;  %3048 = vmatpush3.msra.mxu0 %v2320_v18  ;;  %v2351_v18 = vld [vmem:[%s5076_s1 + $0x320] sm:$0xff] }
  0x67   : > { %3087 = vmatpush3.msra.mxu1 %v2341_v19  ;;  %3049 = vmatprep.subr.mxu0 %v3733_v2  ;;  %v2372_v19 = vld [vmem:[%s5076_s1 + $0x3a8] sm:$0xff] }
  0x68   : > { %3038 = vmatmul.mubr.f32.gmra.mxu1 %v2285_v20  ;;  %3088 = vmatprep.subr.mxu1 %v3733_v2  ;;  %v2350_v20 = vld [vmem:[%s5076_s1 + $0x318] sm:$0xff] }
  0x69   : > { %2999 = vmatprep.mubr.msk.f32.mxu0 %vm3734_vm0, %v3733_v2  ;;  %3050 = vmatpush3.msra.mxu0 %v2319_v21  ;;  %v2371_v21 = vld [vmem:[%s5076_s1 + $0x3a0] sm:$0xff] }
  0x6a   : > { %3089 = vmatpush3.msra.mxu1 %v2340_v22  ;;  %3000 = vmatmul.mubr.f32.gmra.mxu0 %v2266_v23  ;;  %v2349_v22 = vld [vmem:[%s5076_s1 + $0x310] sm:$0xff]  ;;  %v2370_v23 = vld [vmem:[%s5076_s1 + $0x398] sm:$0xff] }
  0x6b   : > { %3051 = vmatprep.subr.mxu0 %v3733_v2  ;;  %3090 = vmatprep.subr.mxu1 %v3733_v2 }
  0x6c   : > { %3040 = vmatprep.mubr.msk.f32.mxu1 %vm3734_vm0, %v3733_v2  ;;  %3052 = vmatpush3.msra.mxu0 %v2318_v24  ;;  %v2348_v24 = vld [vmem:[%s5076_s1 + $0x308] sm:$0xff] }
  0x6d   : > { %3091 = vmatpush3.msra.mxu1 %v2339_v25  ;;  %3053 = vmatprep.subr.mxu0 %v3733_v2  ;;  %v2369_v25 = vld [vmem:[%s5076_s1 + $0x390] sm:$0xff] }
  0x6e   : > { %3041 = vmatmul.mubr.f32.gmra.mxu1 %v2286_v26  ;;  %3092 = vmatprep.subr.mxu1 %v3733_v2  ;;  %v2347_v26 = vld [vmem:[%s5076_s1 + $0x300] sm:$0xff] }
  0x6f   : > { %3054 = vmatpush3.msra.mxu0 %v2317_v27  ;;  %3093 = vmatpush3.msra.mxu1 %v2338_v28  ;;  %v2368_v27 = vld [vmem:[%s5076_s1 + $0x388] sm:$0xff] }
  0x70   : > { %3055 = vmatprep.subr.mxu0 %v3733_v2  ;;  %3094 = vmatprep.subr.mxu1 %v3733_v2  ;;  %v2344_v28 = vld [vmem:[%s3992_s26 + $0x6] sm:$0xff] }
  0x71   : > { %3056 = vmatpush3.msra.mxu0 %v2316_v29  ;;  %3095 = vmatpush3.msra.mxu1 %v2337_v30  ;;  %v2367_v29 = vld [vmem:[%s5076_s1 + $0x380] sm:$0xff]  ;;  %v2402_v30 = vld [vmem:[%s5076_s1 + $0x478] sm:$0xff] }
  0x72   : > { %3057 = vmatprep.subr.mxu0 %v3733_v2  ;;  %3096 = vmatprep.subr.mxu1 %v3733_v2 }
  0x73   : > { %3058 = vmatpush3.msra.mxu0 %v2315_v31  ;;  %3097 = vmatpush3.msra.mxu1 %v2336_v32  ;;  %v2364_v31 = vld [vmem:[%s3992_s26 + $0x7] sm:$0xff]  ;;  %v2401_v32 = vld [vmem:[%s5076_s1 + $0x470] sm:$0xff] }
  0x74   : > { %3059 = vmatprep.subr.mxu0 %v3733_v2  ;;  %3098 = vmatprep.subr.mxu1 %v3733_v2 }
  0x75   : > { %3060 = vmatpush3.msra.mxu0 %v2314_v33  ;;  %3099 = vmatpush3.msra.mxu1 %v2335_v34  ;;  %v2345_v33 = vld [vmem:[%s3992_s26 + $0xe] sm:$0xff] }
  0x76   : > { %3061 = vmatprep.subr.mxu0 %v3733_v2  ;;  %3100 = vmatprep.subr.mxu1 %v3733_v2  ;;  %v2400_v34 = vld [vmem:[%s5076_s1 + $0x468] sm:$0xff] }
  0x77   : > { %3062 = vmatpush3.msra.mxu0 %v2313_v35  ;;  %3101 = vmatpush3.msra.mxu1 %v2334_v36  ;;  %v2365_v35 = vld [vmem:[%s3992_s26 + $0xf] sm:$0xff]  ;;  %v2399_v36 = vld [vmem:[%s5076_s1 + $0x460] sm:$0xff] }
  0x78   : > { %3063 = vmatprep.subr.mxu0 %v3733_v2  ;;  %3102 = vmatprep.subr.mxu1 %v3733_v2 }
  0x79   : > { %3064 = vmatpush3.msra.mxu0 %v2312_v37  ;;  %3103 = vmatpush3.msra.mxu1 %v2333_v38  ;;  %v2346_v37 = vld [vmem:[%s3992_s26 + $0x16] sm:$0xff] }
  0x7a   : > { %3065 = vmatprep.subr.mxu0 %v3733_v2  ;;  %3104 = vmatprep.subr.mxu1 %v3733_v2  ;;  %v2398_v38 = vld [vmem:[%s5076_s1 + $0x458] sm:$0xff] }
  0x7b   : > { %3066 = vmatpush3.msra.mxu0 %v2311_v39  ;;  %3105 = vmatpush3.msra.mxu1 %v2332_v40  ;;  %v2366_v39 = vld [vmem:[%s3992_s26 + $0x17] sm:$0xff] }
  0x7c   : > { %3067 = vmatprep.subr.mxu0 %v3733_v2  ;;  %3106 = vmatprep.subr.mxu1 %v3733_v2  ;;  %v2397_v40 = vld [vmem:[%s5076_s1 + $0x450] sm:$0xff] }
  0x7d   : > { %3068 = vmatpush3.msra.mxu0 %v2310_v41  ;;  %3107 = vmatpush3.msra.mxu1 %v2331_v42  ;;  %v2396_v41 = vld [vmem:[%s5076_s1 + $0x448] sm:$0xff]  ;;  %v2395_v42 = vld [vmem:[%s5076_s1 + $0x440] sm:$0xff] }
  0x7e   : > { %3069 = vmatprep.subr.mxu0 %v3733_v2  ;;  %3108 = vmatprep.subr.mxu1 %v3733_v2 }
  0x7f   : > { %3070 = vmatpush3.msra.mxu0 %v2309_v43  ;;  %3109 = vmatpush3.msra.mxu1 %v2330_v44  ;;  %v2394_v43 = vld [vmem:[%s5076_s1 + $0x438] sm:$0xff]  ;;  %v2393_v44 = vld [vmem:[%s5076_s1 + $0x430] sm:$0xff] }
  0x80   : > { %3071 = vmatprep.subr.mxu0 %v3733_v2  ;;  %3110 = vmatprep.subr.mxu1 %v3733_v2 }
  0x81   : > { %3072 = vmatpush3.msra.mxu0 %v2308_v45  ;;  %3111 = vmatpush3.msra.mxu1 %v2329_v46  ;;  %v2392_v45 = vld [vmem:[%s5076_s1 + $0x428] sm:$0xff]  ;;  %v2391_v46 = vld [vmem:[%s5076_s1 + $0x420] sm:$0xff] }
  0x82   : > { %3073 = vmatprep.subr.mxu0 %v3733_v2  ;;  %3112 = vmatprep.subr.mxu1 %v3733_v2 }
  0x83   : > { %3074 = vmatpush3.msra.mxu0 %v2307_v47  ;;  %3075 = vmatprep.mubr.msk.f32.mxu0 %vm3734_vm0, %v3733_v2  ;;  %v2390_v47 = vld [vmem:[%s5076_s1 + $0x418] sm:$0xff] }
  0x84   : > { %3113 = vmatpush3.msra.mxu1 %v2328_v48  ;;  %3076 = vmatmul.mubr.f32.vlgmr.msra.gmra.mxu0 %v2304_v49  ;;  %v2389_v48 = vld [vmem:[%s5076_s1 + $0x410] sm:$0xff]  ;;  %v2388_v49 = vld [vmem:[%s5076_s1 + $0x408] sm:$0xff] }
  0x85   : > { %3114 = vmatprep.subr.mxu1 %v3733_v2  ;;  %3125 = vmatprep.subr.mxu0 %v3733_v2 }
  0x86   : > { %3115 = vmatpush3.msra.mxu1 %v2327_v50  ;;  %3116 = vmatprep.mubr.msk.f32.mxu1 %vm3734_vm0, %v3733_v2  ;;  %v2387_v50 = vld [vmem:[%s5076_s1 + $0x400] sm:$0xff] }
  0x87   : > { %3126 = vmatpush3.msra.mxu0 %v2362_v51  ;;  %3117 = vmatmul.mubr.f32.vlgmr.msra.gmra.mxu1 %v2324_v52  ;;  %v2386_v51 = vld [vmem:[%s3992_s26 + $0x18] sm:$0xff] }
  0x88   : > { %3127 = vmatprep.subr.mxu0 %v3733_v2  ;;  %3166 = vmatprep.subr.mxu1 %v3733_v2 }
  0x89   : > { %3078 = vmatprep.mubr.msk.f32.mxu0 %vm3734_vm0, %v3733_v2  ;;  %3128 = vmatpush3.msra.mxu0 %v2361_v53 }
  0x8a   : > { %3167 = vmatpush3.msra.mxu1 %v2382_v54  ;;  %3079 = vmatmul.mubr.f32.gmra.mxu0 %v2305_v55 }
  0x8b   : > { %3129 = vmatprep.subr.mxu0 %v3733_v2  ;;  %3168 = vmatprep.subr.mxu1 %v3733_v2 }
  0x8c   : > { %3119 = vmatprep.mubr.msk.f32.mxu1 %vm3734_vm0, %v3733_v2  ;;  %3130 = vmatpush3.msra.mxu0 %v2360_v56 }
  0x8d   : > { %3169 = vmatpush3.msra.mxu1 %v2381_v57  ;;  %3131 = vmatprep.subr.mxu0 %v3733_v2 }
  0x8e   : > { %3120 = vmatmul.mubr.f32.gmra.mxu1 %v2325_v58  ;;  %3170 = vmatprep.subr.mxu1 %v3733_v2 }
  0x8f   : > { %3081 = vmatprep.mubr.msk.f32.mxu0 %vm3734_vm0, %v3733_v2  ;;  %3132 = vmatpush3.msra.mxu0 %v2359_v59 }
  0x90   : > { %3171 = vmatpush3.msra.mxu1 %v2380_v60  ;;  %3082 = vmatmul.mubr.f32.gmra.mxu0 %v2306_v62 }
  0x91   : > { %3133 = vmatprep.subr.mxu0 %v3733_v2  ;;  %3172 = vmatprep.subr.mxu1 %v3733_v2 }
  0x92   : > { %3122 = vmatprep.mubr.msk.f32.mxu1 %vm3734_vm0, %v3733_v2  ;;  %3134 = vmatpush3.msra.mxu0 %v2358_v63 }
  0x93   : > { %3173 = vmatpush3.msra.mxu1 %v2379_v3  ;;  %3135 = vmatprep.subr.mxu0 %v3733_v2 }
  0x94   : > { %3123 = vmatmul.mubr.f32.gmra.mxu1 %v2326_v4  ;;  %3174 = vmatprep.subr.mxu1 %v3733_v2 }
  0x95   : > { %3136 = vmatpush3.msra.mxu0 %v2357_v5  ;;  %3175 = vmatpush3.msra.mxu1 %v2378_v7 }
  0x96   : > { %3137 = vmatprep.subr.mxu0 %v3733_v2  ;;  %3176 = vmatprep.subr.mxu1 %v3733_v2 }
  0x97   : > { %3138 = vmatpush3.msra.mxu0 %v2356_v8  ;;  %3177 = vmatpush3.msra.mxu1 %v2377_v9 }
  0x98   : > { %3139 = vmatprep.subr.mxu0 %v3733_v2  ;;  %3178 = vmatprep.subr.mxu1 %v3733_v2 }
  0x99   : > { %3140 = vmatpush3.msra.mxu0 %v2355_v10  ;;  %3179 = vmatpush3.msra.mxu1 %v2376_v11 }
  0x9a   : > { %3141 = vmatprep.subr.mxu0 %v3733_v2  ;;  %3180 = vmatprep.subr.mxu1 %v3733_v2 }
  0x9b   : > { %3142 = vmatpush3.msra.mxu0 %v2354_v12  ;;  %3181 = vmatpush3.msra.mxu1 %v2375_v13 }
  0x9c   : > { %3143 = vmatprep.subr.mxu0 %v3733_v2  ;;  %3182 = vmatprep.subr.mxu1 %v3733_v2 }
  0x9d   : > { %3144 = vmatpush3.msra.mxu0 %v2353_v14  ;;  %3183 = vmatpush3.msra.mxu1 %v2374_v15 }
  0x9e   : > { %3145 = vmatprep.subr.mxu0 %v3733_v2  ;;  %3184 = vmatprep.subr.mxu1 %v3733_v2 }
  0x9f   : > { %3146 = vmatpush3.msra.mxu0 %v2352_v16  ;;  %3185 = vmatpush3.msra.mxu1 %v2373_v17 }
  0xa0   : > { %3147 = vmatprep.subr.mxu0 %v3733_v2  ;;  %3186 = vmatprep.subr.mxu1 %v3733_v2 }
  0xa1   : > { %3148 = vmatpush3.msra.mxu0 %v2351_v18  ;;  %3187 = vmatpush3.msra.mxu1 %v2372_v19 }
  0xa2   : > { %3149 = vmatprep.subr.mxu0 %v3733_v2  ;;  %3188 = vmatprep.subr.mxu1 %v3733_v2 }
  0xa3   : > { %3150 = vmatpush3.msra.mxu0 %v2350_v20  ;;  %3189 = vmatpush3.msra.mxu1 %v2371_v21 }
  0xa4   : > { %3151 = vmatprep.subr.mxu0 %v3733_v2  ;;  %3190 = vmatprep.subr.mxu1 %v3733_v2 }
  0xa5   : > { %3152 = vmatpush3.msra.mxu0 %v2349_v22  ;;  %3191 = vmatpush3.msra.mxu1 %v2370_v23 }
  0xa6   : > { %3153 = vmatprep.subr.mxu0 %v3733_v2  ;;  %3192 = vmatprep.subr.mxu1 %v3733_v2 }
  0xa7   : > { %3154 = vmatpush3.msra.mxu0 %v2348_v24  ;;  %3193 = vmatpush3.msra.mxu1 %v2369_v25 }
  0xa8   : > { %3155 = vmatprep.subr.mxu0 %v3733_v2  ;;  %3194 = vmatprep.subr.mxu1 %v3733_v2 }
  0xa9   : > { %3156 = vmatpush3.msra.mxu0 %v2347_v26  ;;  %3157 = vmatprep.mubr.msk.f32.mxu0 %vm3734_vm0, %v3733_v2 }
  0xaa   : > { %3195 = vmatpush3.msra.mxu1 %v2368_v27  ;;  %3158 = vmatmul.mubr.f32.vlgmr.msra.gmra.mxu0 %v2344_v28 }
  0xab   : > { %3196 = vmatprep.subr.mxu1 %v3733_v2  ;;  %3207 = vmatprep.subr.mxu0 %v3733_v2 }
  0xac   : > { %3197 = vmatpush3.msra.mxu1 %v2367_v29  ;;  %3198 = vmatprep.mubr.msk.f32.mxu1 %vm3734_vm0, %v3733_v2 }
  0xad   : > { %3208 = vmatpush3.msra.mxu0 %v2402_v30  ;;  %3199 = vmatmul.mubr.f32.vlgmr.msra.gmra.mxu1 %v2364_v31 }
  0xae   : > { %3209 = vmatprep.subr.mxu0 %v3733_v2  ;;  %3160 = vmatprep.mubr.msk.f32.mxu0 %vm3734_vm0, %v3733_v2 }
  0xaf   : > { %3210 = vmatpush3.msra.mxu0 %v2401_v32  ;;  %3201 = vmatprep.mubr.msk.f32.mxu1 %vm3734_vm0, %v3733_v2 }
  0xb0   : > { %3161 = vmatmul.mubr.f32.gmra.mxu0 %v2345_v33  ;;  %3211 = vmatprep.subr.mxu0 %v3733_v2 }
  0xb1   : > { %3212 = vmatpush3.msra.mxu0 %v2400_v34  ;;  %3202 = vmatmul.mubr.f32.gmra.mxu1 %v2365_v35 }
  0xb2   : > { %3213 = vmatprep.subr.mxu0 %v3733_v2  ;;  %3163 = vmatprep.mubr.msk.f32.mxu0 %vm3734_vm0, %v3733_v2 }
  0xb3   : > { %3214 = vmatpush3.msra.mxu0 %v2399_v36  ;;  %3204 = vmatprep.mubr.msk.f32.mxu1 %vm3734_vm0, %v3733_v2 }
  0xb4   : > { %3164 = vmatmul.mubr.f32.gmra.mxu0 %v2346_v37  ;;  %3215 = vmatprep.subr.mxu0 %v3733_v2 }
  0xb5   : > { %3216 = vmatpush3.msra.mxu0 %v2398_v38  ;;  %3205 = vmatmul.mubr.f32.gmra.mxu1 %v2366_v39 }
  0xb6   : > { %3217 = vmatprep.subr.mxu0 %v3733_v2  ;;  %3239 = vmatprep.mubr.msk.f32.mxu0 %vm3734_vm0, %v3733_v2 }
  0xb7   : > { %3218 = vmatpush3.msra.mxu0 %v2397_v40 }
  0xb8   : > { %3219 = vmatprep.subr.mxu0 %v3733_v2 }
  0xb9   : > { %3220 = vmatpush3.msra.mxu0 %v2396_v41 }
  0xba   : > { %3221 = vmatprep.subr.mxu0 %v3733_v2 }
  0xbb   : > { %3222 = vmatpush3.msra.mxu0 %v2395_v42 }
  0xbc   : > { %3223 = vmatprep.subr.mxu0 %v3733_v2 }
  0xbd   : > { %3224 = vmatpush3.msra.mxu0 %v2394_v43 }
  0xbe   : > { %3225 = vmatprep.subr.mxu0 %v3733_v2 }
  0xbf   : > { %3226 = vmatpush3.msra.mxu0 %v2393_v44 }
  0xc0   : > { %3227 = vmatprep.subr.mxu0 %v3733_v2 }
  0xc1   : > { %3228 = vmatpush3.msra.mxu0 %v2392_v45 }
  0xc2   : > { %3229 = vmatprep.subr.mxu0 %v3733_v2 }
  0xc3   : > { %3230 = vmatpush3.msra.mxu0 %v2391_v46 }
  0xc4   : > { %3231 = vmatprep.subr.mxu0 %v3733_v2 }
  0xc5   : > { %3232 = vmatpush3.msra.mxu0 %v2390_v47 }
  0xc6   : > { %3233 = vmatprep.subr.mxu0 %v3733_v2 }
  0xc7   : > { %3234 = vmatpush3.msra.mxu0 %v2389_v48 }
  0xc8   : > { %3235 = vmatprep.subr.mxu0 %v3733_v2 }
  0xc9   : > { %3236 = vmatpush3.msra.mxu0 %v2388_v49 }
  0xca   : > { %3237 = vmatprep.subr.mxu0 %v3733_v2 }
  0xcb   : > { %3238 = vmatpush3.msra.mxu0 %v2387_v50 }
  0xcc   : > { %3240 = vmatmul.mubr.f32.vlgmr.msra.gmra.mxu0 %v4106_v61 }
  0xcd   : > { %3242 = vmatprep.mubr.msk.f32.mxu0 %vm3734_vm0, %v3733_v2 }
  0xd0   : > { %3243 = vmatmul.mubr.f32.gmra.mxu0 %v4131_v6 }
  0xd1   : > { %3245 = vmatprep.mubr.msk.f32.mxu0 %vm3734_vm0, %v3733_v2 }
  0xd4   : > { %3246 = vmatmul.mubr.f32.gmra.mxu0 %v2386_v51 }
  0xf9   : > { %v324_v52 = vpop.f32.mrf.mxu0 }
  0xfb   : > { %v404_v53 = vpop.f32.mrf.mxu1  ;;  %v2913_v54 = vpop.f32.mrf.mxu0 }
  0xfc   : > { %v405_v55 = vadd.f32 %v404_v53, %v324_v52 }
  0xfd   : > { %v2954_v56 = vpop.f32.mrf.mxu1 }
 0x111   : > { %v329_v57 = vpop.f32.mrf.mxu0 }
 0x113   : > { %v2916_v58 = vpop.f32.mrf.mxu0 }
 0x114   : > { %v409_v59 = vpop.f32.mrf.mxu1 }
 0x115   : > { %v410_v60 = vadd.f32 %v409_v59, %v329_v57  ;;  %v2404_v59 = vld [vmem:[%s5077_s2 + $0x1] ss:$0 sm:$0xff] }
 0x116   : > { %v2957_v61 = vpop.f32.mrf.mxu1 }
 0x117   : > { %v334_v62 = vpop.f32.mrf.mxu0 }
 0x119   : > { %v2919_v63 = vpop.f32.mrf.mxu0 }
 0x11a   : > { %v414_v3 = vpop.f32.mrf.mxu1 }
 0x11b   : > { %v415_v4 = vadd.f32 %v414_v3, %v334_v62 }
 0x11c   : > { %v2960_v6 = vpop.f32.mrf.mxu1 }
 0x11e   : > { %v506_v5 = vpop.f32.mrf.mxu0 }
 0x11f   : > { %v520_v7 = vadd.f32 %v506_v5, %v405_v55  ;;  %v2403_v55 = vld [vmem:[%s5077_s2] ss:$0 sm:$0xff] }
 0x120   : > { %v2995_v2 = vpop.f32.mrf.mxu0 }
 0x121   : > { %v611_v8 = vpop.f32.mrf.mxu1 }
 0x122   : > { %v625_v9 = vadd.f32 %v611_v8, %v520_v7 }
 0x123   : > { %v3036_v10 = vpop.f32.mrf.mxu1 }
 0x124   : > { %v511_v11 = vpop.f32.mrf.mxu0 }
 0x125   : > { %v521_v12 = vadd.f32 %v511_v11, %v410_v60 }
 0x126   : > { %v2998_v13 = vpop.f32.mrf.mxu0 }
 0x128   : > { %v616_v14 = vpop.f32.mrf.mxu1 }
 0x129   : > { %v626_v15 = vadd.f32 %v616_v14, %v521_v12 }
 0x12a   : > { %v516_v16 = vpop.f32.mrf.mxu0  ;;  %v3039_v17 = vpop.f32.mrf.mxu1 }
 0x12b   : > { %v522_v18 = vadd.f32 %v516_v16, %v415_v4 }
 0x12c   : > { %v3001_v19 = vpop.f32.mrf.mxu0 }
 0x12e   : > { %v621_v20 = vpop.f32.mrf.mxu1 }
 0x12f   : > { %v627_v21 = vadd.f32 %v621_v20, %v522_v18 }
 0x130   : > { %v3042_v22 = vpop.f32.mrf.mxu1 }
 0x144   : > { %v716_v23 = vpop.f32.mrf.mxu0 }
 0x145   : > { %v730_v24 = vadd.f32 %v716_v23, %v625_v9 }
 0x146   : > { %v3077_v25 = vpop.f32.mrf.mxu0 }
 0x147   : > { %v821_v26 = vpop.f32.mrf.mxu1 }
 0x148   : > { %v835_v27 = vadd.f32 %v821_v26, %v730_v24 }
 0x149   : > { %v3118_v28 = vpop.f32.mrf.mxu1 }
 0x14a   : > { %v721_v29 = vpop.f32.mrf.mxu0 }
 0x14b   : > { %v731_v30 = vadd.f32 %v721_v29, %v626_v15 }
 0x14c   : > { %v3080_v31 = vpop.f32.mrf.mxu0 }
 0x14e   : > { %v826_v32 = vpop.f32.mrf.mxu1 }
 0x14f   : > { %v836_v33 = vadd.f32 %v826_v32, %v731_v30 }
 0x150   : > { %v726_v34 = vpop.f32.mrf.mxu0  ;;  %v3121_v35 = vpop.f32.mrf.mxu1 }
 0x151   : > { %v732_v52 = vadd.f32 %v726_v34, %v627_v21 }
 0x152   : > { %v3083_v36 = vpop.f32.mrf.mxu0 }
 0x154   : > { %v831_v37 = vpop.f32.mrf.mxu1 }
 0x155   : > { %v837_v57 = vadd.f32 %v831_v37, %v732_v52 }
 0x156   : > { %v3124_v38 = vpop.f32.mrf.mxu1 }
 0x16a   : > { %v926_v39 = vpop.f32.mrf.mxu0 }
 0x16b   : > { %v940_v51 = vadd.f32 %v926_v39, %v835_v27 }
 0x16c   : > { %v3159_v40 = vpop.f32.mrf.mxu0 }
 0x16d   : > { %v1031_v41 = vpop.f32.mrf.mxu1 }
 0x16e   : > { %v1045_v53 = vadd.f32 %v1031_v41, %v940_v51 }
 0x16f   : > { %v3200_v42 = vpop.f32.mrf.mxu1 }
 0x170   : > { %v931_v43 = vpop.f32.mrf.mxu0 }
 0x171   : > { %v1036_v44 = vpop.f32.mrf.mxu1  ;;  %v941_v54 = vadd.f32 %v931_v43, %v836_v33 }
 0x172   : > { %v3162_v45 = vpop.f32.mrf.mxu0 }
 0x173   : > { %v3203_v46 = vpop.f32.mrf.mxu1  ;;  %v1046_v61 = vadd.f32 %v1036_v44, %v941_v54 }
 0x174   : > { %v936_v47 = vpop.f32.mrf.mxu0 }
 0x175   : > { %v1041_v48 = vpop.f32.mrf.mxu1  ;;  %v942_v62 = vadd.f32 %v936_v47, %v837_v57 }
 0x176   : > { %v3165_v49 = vpop.f32.mrf.mxu0 }
 0x177   : > { %v3206_v50 = vpop.f32.mrf.mxu1  ;;  %v1047_v7 = vadd.f32 %v1041_v48, %v942_v62 }
 0x18c   : > { %v1136_v56 = vpop.f32.mrf.mxu0 }
 0x18d   : > { %v1150_v58 = vadd.f32 %v1136_v56, %v1045_v53 }
 0x18e   : > { %v3241_v60 = vpop.f32.mrf.mxu0 }
 0x18f   : > { %v1157_v63 = vmul.f32 %v2403_v55, %v1150_v58 }
 0x190   : > { %v1141_v3 = vpop.f32.mrf.mxu0 }
 0x191   : > { %v1164_v4 = vadd.f32 %v2404_v59, %v1157_v63  ;;  %v1151_v6 = vadd.f32 %v1141_v3, %v1046_v61 }
 0x192   : > { %v3244_v5 = vpop.f32.mrf.mxu0 }
 0x193   : > { %v1167_v2 = vmax.f32 %v1164_v4, 0.0  ;;  %v1158_v8 = vmul.f32 %v2403_v55, %v1151_v6 }
 0x194   : > { %v1146_v9 = vpop.f32.mrf.mxu0 }
 0x195   : > { %v1165_v10 = vadd.f32 %v2404_v59, %v1158_v8  ;;  %v1152_v11 = vadd.f32 %v1146_v9, %v1047_v7 }
 0x196   : > { %v3247_v12 = vpop.f32.mrf.mxu0 }
 0x197   : > { %v1168_v13 = vmax.f32 %v1165_v10, 0.0  ;;  %v1159_v14 = vmul.f32 %v2403_v55, %v1152_v11  ;;  %1177 = sbr.rel (%p1174_p0) target bundleno = 414 (0x19e), region = 40 }
 0x199   : > { %v1166_v15 = vadd.f32 %v2404_v59, %v1159_v14 }
 0x19b   : > { %v1169_v16 = vmax.f32 %v1166_v15, 0.0 }
 0x19c   : > { %1178 = vst [vmem:[#allocation2] sm:$0xff] %v1167_v2  ;;  %1179 = vst [vmem:[#allocation2 + $0x8] sm:$0xff] %v1168_v13 }
 0x19d   : > { %1180 = vst [vmem:[#allocation2 + $0x10] sm:$0xff] %v1169_v16 }
 0x19e PF: > { %1183 = sbr.rel (!%p1174_p0) target bundleno = 427 (0x1ab), region = 44  ;;  %v1184_v17 = vlaneseq (%p1174_p0)  ;;  %s5088_s13 = sadd.s32 (%p1174_p0), 4294967292, %s3872_s23 }
 0x19f   : > { %v1188_v18 = vstv (%p1174_p0), %s5088_s13 }
 0x1a0   : > { %v1185_v19 = vshrl.u32 (%p1174_p0), %v1184_v17, 7 }
 0x1a2   : > { %v1189_v20 = vadd.s32 (%p1174_p0), %v1188_v18, %v1185_v19  ;;  %v1186_v21 = vadd.s32 (%p1174_p0), 8, %v1185_v19  ;;  %v1187_v22 = vadd.s32 (%p1174_p0), 16, %v1185_v19 }
 0x1a4   : > { %vm1192_vm1 = vcmp.ge.s32.totalorder %v1189_v20, 0  ;;  %vm1195_vm2 = vcmp.lt.s32.totalorder %v1189_v20, 50  ;;  %v1190_v23 = vadd.s32 %v1188_v18, %v1186_v21  ;;  %v1191_v24 = vadd.s32 %v1188_v18, %v1187_v22 }
 0x1a5   : > { %vm1198_vm3 = vmand %vm1192_vm1, %vm1195_vm2 }
 0x1a6   : > { %v1207_v25 = vsel %vm1198_vm3, %v1167_v2, 0.0  ;;  %vm1193_vm4 = vcmp.ge.s32.totalorder %v1190_v23, 0  ;;  %vm1196_vm5 = vcmp.lt.s32.totalorder %v1190_v23, 50  ;;  %vm1194_vm6 = vcmp.ge.s32.totalorder %v1191_v24, 0 }
 0x1a7   : > { %1210 = vst [vmem:[#allocation2] sm:$0xff] %v1207_v25  ;;  %vm1199_vm7 = vmand %vm1193_vm4, %vm1196_vm5  ;;  %vm1197_vm8 = vcmp.lt.s32.totalorder %v1191_v24, 50 }
 0x1a8   : > { %v1208_v26 = vsel %vm1199_vm7, %v1168_v13, 0.0  ;;  %vm1200_vm9 = vmand %vm1194_vm6, %vm1197_vm8 }
 0x1a9   : > { %1211 = vst [vmem:[#allocation2 + $0x8] sm:$0xff] %v1208_v26  ;;  %v1209_v27 = vsel %vm1200_vm9, %v1169_v16, 0.0 }
 0x1aa   : > { %1212 = vst [vmem:[#allocation2 + $0x10] sm:$0xff] %v1209_v27 }
 0x1ab PF: > { %v2421_v28 = vld [vmem:[%s5078_s3 + $0xf8] sm:$0xff]  ;;  %v2420_v30 = vld [vmem:[%s5078_s3 + $0xf0] sm:$0xff]  ;;  %v2419_v32 = vld [vmem:[%s5078_s3 + $0xe8] sm:$0xff]  ;;  %s2090_s5 = sadd.s32 16, %s3872_s23 }
 0x1ac   : > { %v1230_v29 = vld [vmem:[%s5078_s3 + $0x78] sm:$0xff]  ;;  %3248 = vmatprep.subr.mxu1 %v2421_v28  ;;  %v1229_v31 = vld [vmem:[%s5078_s3 + $0x70] sm:$0xff]  ;;  %v1228_v33 = vld [vmem:[%s5078_s3 + $0x68] sm:$0xff]  ;;  %p2538_p2 = scmp.gt.s32.totalorder %s2090_s5, 50 }
 0x1ad   : > { %3283 = vmatprep.subr.mxu0 %v1230_v29  ;;  %3249 = vmatpush3.msra.mxu1 %v2421_v28  ;;  %v2418_v34 = vld [vmem:[%s5078_s3 + $0xe0] sm:$0xff]  ;;  %v2417_v36 = vld [vmem:[%s5078_s3 + $0xd8] sm:$0xff]  ;;  %v2416_v38 = vld [vmem:[%s5078_s3 + $0xd0] sm:$0xff] }
 0x1ae   : > { %3284 = vmatpush3.msra.mxu0 %v1230_v29  ;;  %3250 = vmatprep.subr.mxu1 %v2420_v30  ;;  %v1227_v35 = vld [vmem:[%s5078_s3 + $0x60] sm:$0xff]  ;;  %v1226_v37 = vld [vmem:[%s5078_s3 + $0x58] sm:$0xff]  ;;  %v1225_v39 = vld [vmem:[%s5078_s3 + $0x50] sm:$0xff] }
 0x1af   : > { %3285 = vmatprep.subr.mxu0 %v1229_v31  ;;  %3251 = vmatpush3.msra.mxu1 %v2420_v30  ;;  %v2415_v40 = vld [vmem:[%s5078_s3 + $0xc8] sm:$0xff]  ;;  %v2414_v42 = vld [vmem:[%s5078_s3 + $0xc0] sm:$0xff]  ;;  %v2413_v44 = vld [vmem:[%s5078_s3 + $0xb8] sm:$0xff] }
 0x1b0   : > { %3286 = vmatpush3.msra.mxu0 %v1229_v31  ;;  %3252 = vmatprep.subr.mxu1 %v2419_v32  ;;  %v1224_v41 = vld [vmem:[%s5078_s3 + $0x48] sm:$0xff]  ;;  %v1223_v43 = vld [vmem:[%s5078_s3 + $0x40] sm:$0xff]  ;;  %v1222_v45 = vld [vmem:[%s5078_s3 + $0x38] sm:$0xff] }
 0x1b1   : > { %3287 = vmatprep.subr.mxu0 %v1228_v33  ;;  %3253 = vmatpush3.msra.mxu1 %v2419_v32  ;;  %v2412_v46 = vld [vmem:[%s5078_s3 + $0xb0] sm:$0xff]  ;;  %v2411_v48 = vld [vmem:[%s5078_s3 + $0xa8] sm:$0xff]  ;;  %v2410_v50 = vld [vmem:[%s5078_s3 + $0xa0] sm:$0xff] }
 0x1b2   : > { %3288 = vmatpush3.msra.mxu0 %v1228_v33  ;;  %3254 = vmatprep.subr.mxu1 %v2418_v34  ;;  %v1221_v47 = vld [vmem:[%s5078_s3 + $0x30] sm:$0xff]  ;;  %v1220_v49 = vld [vmem:[%s5078_s3 + $0x28] sm:$0xff]  ;;  %v1219_v51 = vld [vmem:[%s5078_s3 + $0x20] sm:$0xff] }
 0x1b3   : > { %3289 = vmatprep.subr.mxu0 %v1227_v35  ;;  %3255 = vmatpush3.msra.mxu1 %v2418_v34  ;;  %v2409_v52 = vld [vmem:[%s5078_s3 + $0x98] sm:$0xff]  ;;  %v2408_v54 = vld [vmem:[%s5078_s3 + $0x90] sm:$0xff]  ;;  %v2407_v56 = vld [vmem:[%s5078_s3 + $0x88] sm:$0xff] }
 0x1b4   : > { %3290 = vmatpush3.msra.mxu0 %v1227_v35  ;;  %3256 = vmatprep.subr.mxu1 %v2417_v36  ;;  %v1218_v53 = vld [vmem:[%s5078_s3 + $0x18] sm:$0xff]  ;;  %v1217_v55 = vld [vmem:[%s5078_s3 + $0x10] sm:$0xff]  ;;  %v1216_v57 = vld [vmem:[%s5078_s3 + $0x8] sm:$0xff] }
 0x1b5   : > { %3291 = vmatprep.subr.mxu0 %v1226_v37  ;;  %3257 = vmatpush3.msra.mxu1 %v2417_v36  ;;  %v2406_v58 = vld [vmem:[%s5078_s3 + $0x80] sm:$0xff]  ;;  %v1232_v62 = vld [vmem:[#allocation2 + $0x9] sm:$0xff]  ;;  %v2437_v3 = vld [vmem:[%s5078_s3 + $0x178] sm:$0xff] }
 0x1b6   : > { %3292 = vmatpush3.msra.mxu0 %v1226_v37  ;;  %3258 = vmatprep.subr.mxu1 %v2416_v38  ;;  %v1215_v59 = vld [vmem:[%s5078_s3] sm:$0xff]  ;;  %v4656_v63 = vld [vmem:[#allocation2 + $0x8] sm:$0xff]  ;;  %v2453_v4 = vld [vmem:[%s5078_s3 + $0x1f8] sm:$0xff] }
 0x1b7   : > { %3293 = vmatprep.subr.mxu0 %v1225_v39  ;;  %3259 = vmatpush3.msra.mxu1 %v2416_v38  ;;  %v1231_v60 = vld [vmem:[#allocation2 + $0x1] sm:$0xff]  ;;  %v2436_v6 = vld [vmem:[%s5078_s3 + $0x170] sm:$0xff]  ;;  %v2433_v10 = vld [vmem:[%s5078_s3 + $0x158] sm:$0xff] }
 0x1b8   : > { %3294 = vmatpush3.msra.mxu0 %v1225_v39  ;;  %3260 = vmatprep.subr.mxu1 %v2415_v40  ;;  %v1213_v61 = vld [vmem:[#allocation2] sm:$0xff]  ;;  %v2452_v5 = vld [vmem:[%s5078_s3 + $0x1f0] sm:$0xff]  ;;  %v2435_v7 = vld [vmem:[%s5078_s3 + $0x168] sm:$0xff] }
 0x1b9   : > { %3295 = vmatprep.subr.mxu0 %v1224_v41  ;;  %3261 = vmatpush3.msra.mxu1 %v2415_v40  ;;  %v2451_v2 = vld [vmem:[%s5078_s3 + $0x1e8] sm:$0xff]  ;;  %v2434_v8 = vld [vmem:[%s5078_s3 + $0x160] sm:$0xff]  ;;  %v2449_v11 = vld [vmem:[%s5078_s3 + $0x1d8] sm:$0xff] }
 0x1ba   : > { %3296 = vmatpush3.msra.mxu0 %v1224_v41  ;;  %3262 = vmatprep.subr.mxu1 %v2414_v42  ;;  %v2450_v9 = vld [vmem:[%s5078_s3 + $0x1e0] sm:$0xff]  ;;  %v2432_v12 = vld [vmem:[%s5078_s3 + $0x150] sm:$0xff]  ;;  %v2431_v14 = vld [vmem:[%s5078_s3 + $0x148] sm:$0xff] }
 0x1bb   : > { %3297 = vmatprep.subr.mxu0 %v1223_v43  ;;  %3263 = vmatpush3.msra.mxu1 %v2414_v42  ;;  %v2448_v13 = vld [vmem:[%s5078_s3 + $0x1d0] sm:$0xff]  ;;  %v2447_v15 = vld [vmem:[%s5078_s3 + $0x1c8] sm:$0xff]  ;;  %v2430_v16 = vld [vmem:[%s5078_s3 + $0x140] sm:$0xff] }
 0x1bc   : > { %3298 = vmatpush3.msra.mxu0 %v1223_v43  ;;  %3264 = vmatprep.subr.mxu1 %v2413_v44  ;;  %v2446_v17 = vld [vmem:[%s5078_s3 + $0x1c0] sm:$0xff]  ;;  %v2429_v18 = vld [vmem:[%s5078_s3 + $0x138] sm:$0xff]  ;;  %v2428_v20 = vld [vmem:[%s5078_s3 + $0x130] sm:$0xff] }
 0x1bd   : > { %3299 = vmatprep.subr.mxu0 %v1222_v45  ;;  %3265 = vmatpush3.msra.mxu1 %v2413_v44  ;;  %v2445_v19 = vld [vmem:[%s5078_s3 + $0x1b8] sm:$0xff]  ;;  %v2444_v21 = vld [vmem:[%s5078_s3 + $0x1b0] sm:$0xff]  ;;  %v2427_v22 = vld [vmem:[%s5078_s3 + $0x128] sm:$0xff] }
 0x1be   : > { %3300 = vmatpush3.msra.mxu0 %v1222_v45  ;;  %3266 = vmatprep.subr.mxu1 %v2412_v46  ;;  %v2443_v23 = vld [vmem:[%s5078_s3 + $0x1a8] sm:$0xff]  ;;  %v2426_v24 = vld [vmem:[%s5078_s3 + $0x120] sm:$0xff]  ;;  %v2425_v26 = vld [vmem:[%s5078_s3 + $0x118] sm:$0xff] }
 0x1bf   : > { %3301 = vmatprep.subr.mxu0 %v1221_v47  ;;  %3267 = vmatpush3.msra.mxu1 %v2412_v46  ;;  %v2442_v25 = vld [vmem:[%s5078_s3 + $0x1a0] sm:$0xff]  ;;  %v2441_v27 = vld [vmem:[%s5078_s3 + $0x198] sm:$0xff]  ;;  %v2424_v28 = vld [vmem:[%s5078_s3 + $0x110] sm:$0xff] }
 0x1c0   : > { %3302 = vmatpush3.msra.mxu0 %v1221_v47  ;;  %3268 = vmatprep.subr.mxu1 %v2411_v48  ;;  %v2440_v29 = vld [vmem:[%s5078_s3 + $0x190] sm:$0xff]  ;;  %v2423_v30 = vld [vmem:[%s5078_s3 + $0x108] sm:$0xff]  ;;  %v2422_v33 = vld [vmem:[%s5078_s3 + $0x100] sm:$0xff] }
 0x1c1   : > { %3303 = vmatprep.subr.mxu0 %v1220_v49  ;;  %3269 = vmatpush3.msra.mxu1 %v2411_v48  ;;  %v2439_v31 = vld [vmem:[%s5078_s3 + $0x188] sm:$0xff]  ;;  %v2438_v34 = vld [vmem:[%s5078_s3 + $0x180] sm:$0xff]  ;;  %v2469_v36 = vld [vmem:[%s5078_s3 + $0x278] sm:$0xff] }
 0x1c2   : > { %3304 = vmatpush3.msra.mxu0 %v1220_v49  ;;  %3270 = vmatprep.subr.mxu1 %v2410_v50  ;;  %v1400_v32 = vld [vmem:[#allocation2 + $0x2] sm:$0xff]  ;;  %v1401_v35 = vld [vmem:[#allocation2 + $0xa] sm:$0xff]  ;;  %v2485_v40 = vld [vmem:[%s5078_s3 + $0x2f8] sm:$0xff] }
 0x1c3   : > { %3305 = vmatprep.subr.mxu0 %v1219_v51  ;;  %3271 = vmatpush3.msra.mxu1 %v2410_v50  ;;  %v1496_v37 = vld [vmem:[#allocation2 + $0x3] sm:$0xff]  ;;  %v1497_v38 = vld [vmem:[#allocation2 + $0xb] sm:$0xff]  ;;  %v2465_v45 = vld [vmem:[%s5078_s3 + $0x258] sm:$0xff] }
 0x1c4   : > { %3306 = vmatpush3.msra.mxu0 %v1219_v51  ;;  %3272 = vmatprep.subr.mxu1 %v2409_v52  ;;  %v2468_v39 = vld [vmem:[%s5078_s3 + $0x270] sm:$0xff]  ;;  %v2467_v41 = vld [vmem:[%s5078_s3 + $0x268] sm:$0xff]  ;;  %v2466_v43 = vld [vmem:[%s5078_s3 + $0x260] sm:$0xff] }
 0x1c5   : > { %3307 = vmatprep.subr.mxu0 %v1218_v53  ;;  %3273 = vmatpush3.msra.mxu1 %v2409_v52  ;;  %v2484_v42 = vld [vmem:[%s5078_s3 + $0x2f0] sm:$0xff]  ;;  %v2483_v44 = vld [vmem:[%s5078_s3 + $0x2e8] sm:$0xff]  ;;  %v2482_v46 = vld [vmem:[%s5078_s3 + $0x2e0] sm:$0xff] }
 0x1c6   : > { %3308 = vmatpush3.msra.mxu0 %v1218_v53  ;;  %3274 = vmatprep.subr.mxu1 %v2408_v54  ;;  %v2464_v47 = vld [vmem:[%s5078_s3 + $0x250] sm:$0xff]  ;;  %v2481_v48 = vld [vmem:[%s5078_s3 + $0x2d8] sm:$0xff]  ;;  %v2463_v49 = vld [vmem:[%s5078_s3 + $0x248] sm:$0xff] }
 0x1c7   : > { %3309 = vmatprep.subr.mxu0 %v1217_v55  ;;  %3275 = vmatpush3.msra.mxu1 %v2408_v54  ;;  %v2480_v50 = vld [vmem:[%s5078_s3 + $0x2d0] sm:$0xff]  ;;  %v2462_v51 = vld [vmem:[%s5078_s3 + $0x240] sm:$0xff]  ;;  %v2479_v52 = vld [vmem:[%s5078_s3 + $0x2c8] sm:$0xff] }
 0x1c8   : > { %3310 = vmatpush3.msra.mxu0 %v1217_v55  ;;  %3276 = vmatprep.subr.mxu1 %v2407_v56  ;;  %v2461_v53 = vld [vmem:[%s5078_s3 + $0x238] sm:$0xff]  ;;  %v2478_v54 = vld [vmem:[%s5078_s3 + $0x2c0] sm:$0xff]  ;;  %v2460_v55 = vld [vmem:[%s5078_s3 + $0x230] sm:$0xff] }
 0x1c9   : > { %3311 = vmatprep.subr.mxu0 %v1216_v57  ;;  %3277 = vmatpush3.msra.mxu1 %v2407_v56  ;;  %v2477_v56 = vld [vmem:[%s5078_s3 + $0x2b8] sm:$0xff] }
 0x1ca   : > { %3312 = vmatpush3.msra.mxu0 %v1216_v57  ;;  %3278 = vmatprep.subr.mxu1 %v2406_v58  ;;  %v2459_v57 = vld [vmem:[%s5078_s3 + $0x228] sm:$0xff] }
 0x1cb   : > { %3313 = vmatprep.subr.mxu0 %v1215_v59  ;;  %3279 = vmatpush3.msra.mxu1 %v2406_v58  ;;  %v2476_v58 = vld [vmem:[%s5078_s3 + $0x2b0] sm:$0xff] }
 0x1cc   : > { %3280 = vmatprep.mubr.f32.mxu1 %v1231_v60  ;;  %3314 = vmatpush3.msra.mxu0 %v1215_v59  ;;  %v2458_v59 = vld [vmem:[%s5078_s3 + $0x220] sm:$0xff]  ;;  %v2475_v60 = vld [vmem:[%s5078_s3 + $0x2a8] sm:$0xff] }
 0x1cd   : > { %3315 = vmatprep.mubr.f32.mxu0 %v1213_v61  ;;  %3281 = vmatmul.mubr.f32.vlgmr.msra.gmra.mxu1 %v1232_v62  ;;  %v2457_v61 = vld [vmem:[%s5078_s3 + $0x218] sm:$0xff]  ;;  %v2474_v62 = vld [vmem:[%s5078_s3 + $0x2a0] sm:$0xff] }
 0x1ce   : > { %3316 = vmatmul.mubr.f32.vlgmr.msra.gmra.mxu0 %v4656_v63  ;;  %3318 = vmatprep.subr.mxu1 %v2437_v3 }
 0x1cf   : > { %3353 = vmatprep.subr.mxu0 %v2453_v4  ;;  %3319 = vmatpush3.msra.mxu1 %v2437_v3  ;;  %v2456_v3 = vld [vmem:[%s5078_s3 + $0x210] sm:$0xff] }
 0x1d0   : > { %3354 = vmatpush3.msra.mxu0 %v2453_v4  ;;  %3320 = vmatprep.subr.mxu1 %v2436_v6  ;;  %v2473_v4 = vld [vmem:[%s5078_s3 + $0x298] sm:$0xff] }
 0x1d1   : > { %3355 = vmatprep.subr.mxu0 %v2452_v5  ;;  %3321 = vmatpush3.msra.mxu1 %v2436_v6  ;;  %v2455_v6 = vld [vmem:[%s5078_s3 + $0x208] sm:$0xff] }
 0x1d2   : > { %3356 = vmatpush3.msra.mxu0 %v2452_v5  ;;  %3322 = vmatprep.subr.mxu1 %v2435_v7  ;;  %v2472_v5 = vld [vmem:[%s5078_s3 + $0x290] sm:$0xff] }
 0x1d3   : > { %3357 = vmatprep.subr.mxu0 %v2451_v2  ;;  %3323 = vmatpush3.msra.mxu1 %v2435_v7  ;;  %v2454_v7 = vld [vmem:[%s5078_s3 + $0x200] sm:$0xff] }
 0x1d4   : > { %3358 = vmatpush3.msra.mxu0 %v2451_v2  ;;  %3324 = vmatprep.subr.mxu1 %v2434_v8  ;;  %v2471_v2 = vld [vmem:[%s5078_s3 + $0x288] sm:$0xff] }
 0x1d5   : > { %3359 = vmatprep.subr.mxu0 %v2450_v9  ;;  %3325 = vmatpush3.msra.mxu1 %v2434_v8  ;;  %v1592_v8 = vld [vmem:[#allocation2 + $0x4] sm:$0xff] }
 0x1d6   : > { %3360 = vmatpush3.msra.mxu0 %v2450_v9  ;;  %3326 = vmatprep.subr.mxu1 %v2433_v10  ;;  %v1593_v9 = vld [vmem:[#allocation2 + $0xc] sm:$0xff] }
 0x1d7   : > { %3361 = vmatprep.subr.mxu0 %v2449_v11  ;;  %3327 = vmatpush3.msra.mxu1 %v2433_v10  ;;  %v2470_v10 = vld [vmem:[%s5078_s3 + $0x280] sm:$0xff] }
 0x1d8   : > { %3362 = vmatpush3.msra.mxu0 %v2449_v11  ;;  %3328 = vmatprep.subr.mxu1 %v2432_v12  ;;  %v2501_v11 = vld [vmem:[%s5078_s3 + $0x378] sm:$0xff] }
 0x1d9   : > { %3363 = vmatprep.subr.mxu0 %v2448_v13  ;;  %3329 = vmatpush3.msra.mxu1 %v2432_v12  ;;  %v1688_v12 = vld [vmem:[#allocation2 + $0x5] sm:$0xff] }
 0x1da   : > { %3364 = vmatpush3.msra.mxu0 %v2448_v13  ;;  %3330 = vmatprep.subr.mxu1 %v2431_v14  ;;  %v1689_v13 = vld [vmem:[#allocation2 + $0xd] sm:$0xff] }
 0x1db   : > { %3365 = vmatprep.subr.mxu0 %v2447_v15  ;;  %3331 = vmatpush3.msra.mxu1 %v2431_v14  ;;  %v2500_v14 = vld [vmem:[%s5078_s3 + $0x370] sm:$0xff] }
 0x1dc   : > { %3366 = vmatpush3.msra.mxu0 %v2447_v15  ;;  %3332 = vmatprep.subr.mxu1 %v2430_v16  ;;  %v2517_v15 = vld [vmem:[%s5078_s3 + $0x3f8] sm:$0xff] }
 0x1dd   : > { %3367 = vmatprep.subr.mxu0 %v2446_v17  ;;  %3333 = vmatpush3.msra.mxu1 %v2430_v16  ;;  %v2499_v16 = vld [vmem:[%s5078_s3 + $0x368] sm:$0xff] }
 0x1de   : > { %3368 = vmatpush3.msra.mxu0 %v2446_v17  ;;  %3334 = vmatprep.subr.mxu1 %v2429_v18  ;;  %v2516_v17 = vld [vmem:[%s5078_s3 + $0x3f0] sm:$0xff] }
 0x1df   : > { %3369 = vmatprep.subr.mxu0 %v2445_v19  ;;  %3335 = vmatpush3.msra.mxu1 %v2429_v18  ;;  %v2498_v18 = vld [vmem:[%s5078_s3 + $0x360] sm:$0xff] }
 0x1e0   : > { %3370 = vmatpush3.msra.mxu0 %v2445_v19  ;;  %3336 = vmatprep.subr.mxu1 %v2428_v20  ;;  %v2515_v19 = vld [vmem:[%s5078_s3 + $0x3e8] sm:$0xff] }
 0x1e1   : > { %3371 = vmatprep.subr.mxu0 %v2444_v21  ;;  %3337 = vmatpush3.msra.mxu1 %v2428_v20  ;;  %v2497_v20 = vld [vmem:[%s5078_s3 + $0x358] sm:$0xff] }
 0x1e2   : > { %3372 = vmatpush3.msra.mxu0 %v2444_v21  ;;  %3338 = vmatprep.subr.mxu1 %v2427_v22  ;;  %v2514_v21 = vld [vmem:[%s5078_s3 + $0x3e0] sm:$0xff] }
 0x1e3   : > { %3373 = vmatprep.subr.mxu0 %v2443_v23  ;;  %3339 = vmatpush3.msra.mxu1 %v2427_v22  ;;  %v2496_v22 = vld [vmem:[%s5078_s3 + $0x350] sm:$0xff] }
 0x1e4   : > { %3374 = vmatpush3.msra.mxu0 %v2443_v23  ;;  %3340 = vmatprep.subr.mxu1 %v2426_v24  ;;  %v2513_v23 = vld [vmem:[%s5078_s3 + $0x3d8] sm:$0xff] }
 0x1e5   : > { %3375 = vmatprep.subr.mxu0 %v2442_v25  ;;  %3341 = vmatpush3.msra.mxu1 %v2426_v24  ;;  %v2495_v24 = vld [vmem:[%s5078_s3 + $0x348] sm:$0xff] }
 0x1e6   : > { %3376 = vmatpush3.msra.mxu0 %v2442_v25  ;;  %3342 = vmatprep.subr.mxu1 %v2425_v26  ;;  %v2512_v25 = vld [vmem:[%s5078_s3 + $0x3d0] sm:$0xff] }
 0x1e7   : > { %3377 = vmatprep.subr.mxu0 %v2441_v27  ;;  %3343 = vmatpush3.msra.mxu1 %v2425_v26  ;;  %v2494_v26 = vld [vmem:[%s5078_s3 + $0x340] sm:$0xff] }
 0x1e8   : > { %3378 = vmatpush3.msra.mxu0 %v2441_v27  ;;  %3344 = vmatprep.subr.mxu1 %v2424_v28  ;;  %v2511_v27 = vld [vmem:[%s5078_s3 + $0x3c8] sm:$0xff] }
 0x1e9   : > { %3379 = vmatprep.subr.mxu0 %v2440_v29  ;;  %3345 = vmatpush3.msra.mxu1 %v2424_v28  ;;  %v2493_v28 = vld [vmem:[%s5078_s3 + $0x338] sm:$0xff] }
 0x1ea   : > { %3380 = vmatpush3.msra.mxu0 %v2440_v29  ;;  %3346 = vmatprep.subr.mxu1 %v2423_v30  ;;  %v2510_v29 = vld [vmem:[%s5078_s3 + $0x3c0] sm:$0xff] }
 0x1eb   : > { %3381 = vmatprep.subr.mxu0 %v2439_v31  ;;  %3347 = vmatpush3.msra.mxu1 %v2423_v30  ;;  %v2492_v30 = vld [vmem:[%s5078_s3 + $0x330] sm:$0xff] }
 0x1ec   : > { %3350 = vmatprep.mubr.f32.mxu1 %v1400_v32  ;;  %3348 = vmatprep.subr.mxu1 %v2422_v33  ;;  %v2491_v32 = vld [vmem:[%s5078_s3 + $0x328] sm:$0xff] }
 0x1ed   : > { %3382 = vmatpush3.msra.mxu0 %v2439_v31  ;;  %3349 = vmatpush3.msra.mxu1 %v2422_v33  ;;  %v2509_v31 = vld [vmem:[%s5078_s3 + $0x3b8] sm:$0xff]  ;;  %v2508_v33 = vld [vmem:[%s5078_s3 + $0x3b0] sm:$0xff] }
 0x1ee   : > { %3383 = vmatprep.subr.mxu0 %v2438_v34  ;;  %3351 = vmatmul.mubr.f32.vlgmr.msra.gmra.mxu1 %v1401_v35  ;;  %v2507_v35 = vld [vmem:[%s5078_s3 + $0x3a8] sm:$0xff] }
 0x1ef   : > { %3388 = vmatprep.subr.mxu1 %v2469_v36  ;;  %3384 = vmatpush3.msra.mxu0 %v2438_v34  ;;  %v2490_v34 = vld [vmem:[%s5078_s3 + $0x320] sm:$0xff] }
 0x1f0   : > { %3385 = vmatprep.mubr.f32.mxu0 %v1496_v37  ;;  %3389 = vmatpush3.msra.mxu1 %v2469_v36  ;;  %v2489_v36 = vld [vmem:[%s5078_s3 + $0x318] sm:$0xff]  ;;  %v2506_v37 = vld [vmem:[%s5078_s3 + $0x3a0] sm:$0xff] }
 0x1f1   : > { %3386 = vmatmul.mubr.f32.vlgmr.msra.gmra.mxu0 %v1497_v38  ;;  %3390 = vmatprep.subr.mxu1 %v2468_v39  ;;  %v2488_v38 = vld [vmem:[%s5078_s3 + $0x310] sm:$0xff] }
 0x1f2   : > { %3423 = vmatprep.subr.mxu0 %v2485_v40  ;;  %3391 = vmatpush3.msra.mxu1 %v2468_v39  ;;  %v2505_v39 = vld [vmem:[%s5078_s3 + $0x398] sm:$0xff] }
 0x1f3   : > { %3424 = vmatpush3.msra.mxu0 %v2485_v40  ;;  %3392 = vmatprep.subr.mxu1 %v2467_v41  ;;  %v2487_v40 = vld [vmem:[%s5078_s3 + $0x308] sm:$0xff] }
 0x1f4   : > { %3425 = vmatprep.subr.mxu0 %v2484_v42  ;;  %3393 = vmatpush3.msra.mxu1 %v2467_v41  ;;  %v2504_v41 = vld [vmem:[%s5078_s3 + $0x390] sm:$0xff] }
 0x1f5   : > { %3426 = vmatpush3.msra.mxu0 %v2484_v42  ;;  %3394 = vmatprep.subr.mxu1 %v2466_v43  ;;  %v2486_v42 = vld [vmem:[%s5078_s3 + $0x300] sm:$0xff] }
 0x1f6   : > { %3427 = vmatprep.subr.mxu0 %v2483_v44  ;;  %3395 = vmatpush3.msra.mxu1 %v2466_v43  ;;  %v2503_v43 = vld [vmem:[%s5078_s3 + $0x388] sm:$0xff] }
 0x1f7   : > { %3428 = vmatpush3.msra.mxu0 %v2483_v44  ;;  %3396 = vmatprep.subr.mxu1 %v2465_v45  ;;  %v1784_v44 = vld [vmem:[#allocation2 + $0x6] sm:$0xff] }
 0x1f8   : > { %3429 = vmatprep.subr.mxu0 %v2482_v46  ;;  %3397 = vmatpush3.msra.mxu1 %v2465_v45  ;;  %v1785_v45 = vld [vmem:[#allocation2 + $0xe] sm:$0xff] }
 0x1f9   : > { %3430 = vmatpush3.msra.mxu0 %v2482_v46  ;;  %3398 = vmatprep.subr.mxu1 %v2464_v47  ;;  %v2502_v46 = vld [vmem:[%s5078_s3 + $0x380] sm:$0xff] }
 0x1fa   : > { %3431 = vmatprep.subr.mxu0 %v2481_v48  ;;  %3399 = vmatpush3.msra.mxu1 %v2464_v47  ;;  %v2533_v47 = vld [vmem:[%s5078_s3 + $0x478] sm:$0xff] }
 0x1fb   : > { %3432 = vmatpush3.msra.mxu0 %v2481_v48  ;;  %3400 = vmatprep.subr.mxu1 %v2463_v49  ;;  %v1880_v48 = vld [vmem:[#allocation2 + $0x7] sm:$0xff] }
 0x1fc   : > { %3433 = vmatprep.subr.mxu0 %v2480_v50  ;;  %3401 = vmatpush3.msra.mxu1 %v2463_v49  ;;  %v1881_v49 = vld [vmem:[#allocation2 + $0xf] sm:$0xff] }
 0x1fd   : > { %3434 = vmatpush3.msra.mxu0 %v2480_v50  ;;  %3402 = vmatprep.subr.mxu1 %v2462_v51  ;;  %v2532_v50 = vld [vmem:[%s5078_s3 + $0x470] sm:$0xff] }
 0x1fe   : > { %3435 = vmatprep.subr.mxu0 %v2479_v52  ;;  %3403 = vmatpush3.msra.mxu1 %v2462_v51  ;;  %v2531_v51 = vld [vmem:[%s5078_s3 + $0x468] sm:$0xff] }
 0x1ff   : > { %3436 = vmatpush3.msra.mxu0 %v2479_v52  ;;  %3404 = vmatprep.subr.mxu1 %v2461_v53  ;;  %v2530_v52 = vld [vmem:[%s5078_s3 + $0x460] sm:$0xff] }
 0x200   : > { %3437 = vmatprep.subr.mxu0 %v2478_v54  ;;  %3405 = vmatpush3.msra.mxu1 %v2461_v53  ;;  %v2529_v53 = vld [vmem:[%s5078_s3 + $0x458] sm:$0xff] }
 0x201   : > { %3438 = vmatpush3.msra.mxu0 %v2478_v54  ;;  %3406 = vmatprep.subr.mxu1 %v2460_v55  ;;  %v2528_v54 = vld [vmem:[%s5078_s3 + $0x450] sm:$0xff] }
 0x202   : > { %3439 = vmatprep.subr.mxu0 %v2477_v56  ;;  %3407 = vmatpush3.msra.mxu1 %v2460_v55  ;;  %v2526_v55 = vld [vmem:[%s5078_s3 + $0x440] sm:$0xff] }
 0x203   : > { %3440 = vmatpush3.msra.mxu0 %v2477_v56  ;;  %3408 = vmatprep.subr.mxu1 %v2459_v57  ;;  %v2525_v56 = vld [vmem:[%s5078_s3 + $0x438] sm:$0xff] }
 0x204   : > { %3441 = vmatprep.subr.mxu0 %v2476_v58  ;;  %3409 = vmatpush3.msra.mxu1 %v2459_v57  ;;  %v2524_v57 = vld [vmem:[%s5078_s3 + $0x430] sm:$0xff] }
 0x205   : > { %3442 = vmatpush3.msra.mxu0 %v2476_v58  ;;  %3410 = vmatprep.subr.mxu1 %v2458_v59  ;;  %v2523_v58 = vld [vmem:[%s5078_s3 + $0x428] sm:$0xff] }
 0x206   : > { %3443 = vmatprep.subr.mxu0 %v2475_v60  ;;  %3411 = vmatpush3.msra.mxu1 %v2458_v59  ;;  %v2522_v59 = vld [vmem:[%s5078_s3 + $0x420] sm:$0xff] }
 0x207   : > { %3444 = vmatpush3.msra.mxu0 %v2475_v60  ;;  %3412 = vmatprep.subr.mxu1 %v2457_v61  ;;  %v2521_v60 = vld [vmem:[%s5078_s3 + $0x418] sm:$0xff] }
 0x208   : > { %3445 = vmatprep.subr.mxu0 %v2474_v62  ;;  %3413 = vmatpush3.msra.mxu1 %v2457_v61  ;;  %v2520_v61 = vld [vmem:[%s5078_s3 + $0x410] sm:$0xff] }
 0x209   : > { %3446 = vmatpush3.msra.mxu0 %v2474_v62  ;;  %3414 = vmatprep.subr.mxu1 %v2456_v3  ;;  %v2519_v62 = vld [vmem:[%s5078_s3 + $0x408] sm:$0xff] }
 0x20a   : > { %3447 = vmatprep.subr.mxu0 %v2473_v4  ;;  %3415 = vmatpush3.msra.mxu1 %v2456_v3  ;;  %v2518_v3 = vld [vmem:[%s5078_s3 + $0x400] sm:$0xff] }
 0x20b   : > { %3448 = vmatpush3.msra.mxu0 %v2473_v4  ;;  %3416 = vmatprep.subr.mxu1 %v2455_v6  ;;  %v1977_v4 = vld [vmem:[#allocation2 + $0x10] sm:$0xff] }
 0x20c   : > { %3449 = vmatprep.subr.mxu0 %v2472_v5  ;;  %3417 = vmatpush3.msra.mxu1 %v2455_v6 }
 0x20d   : > { %3450 = vmatpush3.msra.mxu0 %v2472_v5  ;;  %3418 = vmatprep.subr.mxu1 %v2454_v7 }
 0x20e   : > { %3451 = vmatprep.subr.mxu0 %v2471_v2  ;;  %3419 = vmatpush3.msra.mxu1 %v2454_v7 }
 0x20f   : > { %3420 = vmatprep.mubr.f32.mxu1 %v1592_v8  ;;  %3452 = vmatpush3.msra.mxu0 %v2471_v2 }
 0x210   : > { %3421 = vmatmul.mubr.f32.vlgmr.msra.gmra.mxu1 %v1593_v9  ;;  %3453 = vmatprep.subr.mxu0 %v2470_v10 }
 0x211   : > { %3458 = vmatprep.subr.mxu1 %v2501_v11  ;;  %3454 = vmatpush3.msra.mxu0 %v2470_v10 }
 0x212   : > { %3455 = vmatprep.mubr.f32.mxu0 %v1688_v12  ;;  %3459 = vmatpush3.msra.mxu1 %v2501_v11 }
 0x213   : > { %3456 = vmatmul.mubr.f32.vlgmr.msra.gmra.mxu0 %v1689_v13  ;;  %3460 = vmatprep.subr.mxu1 %v2500_v14 }
 0x214   : > { %3493 = vmatprep.subr.mxu0 %v2517_v15  ;;  %3461 = vmatpush3.msra.mxu1 %v2500_v14 }
 0x215   : > { %3494 = vmatpush3.msra.mxu0 %v2517_v15  ;;  %3462 = vmatprep.subr.mxu1 %v2499_v16 }
 0x216   : > { %3495 = vmatprep.subr.mxu0 %v2516_v17  ;;  %3463 = vmatpush3.msra.mxu1 %v2499_v16 }
 0x217   : > { %3496 = vmatpush3.msra.mxu0 %v2516_v17  ;;  %3464 = vmatprep.subr.mxu1 %v2498_v18 }
 0x218   : > { %3497 = vmatprep.subr.mxu0 %v2515_v19  ;;  %3465 = vmatpush3.msra.mxu1 %v2498_v18 }
 0x219   : > { %3498 = vmatpush3.msra.mxu0 %v2515_v19  ;;  %3466 = vmatprep.subr.mxu1 %v2497_v20 }
 0x21a   : > { %3499 = vmatprep.subr.mxu0 %v2514_v21  ;;  %3467 = vmatpush3.msra.mxu1 %v2497_v20 }
 0x21b   : > { %3500 = vmatpush3.msra.mxu0 %v2514_v21  ;;  %3468 = vmatprep.subr.mxu1 %v2496_v22 }
 0x21c   : > { %3501 = vmatprep.subr.mxu0 %v2513_v23  ;;  %3469 = vmatpush3.msra.mxu1 %v2496_v22 }
 0x21d   : > { %3502 = vmatpush3.msra.mxu0 %v2513_v23  ;;  %3470 = vmatprep.subr.mxu1 %v2495_v24 }
 0x21e   : > { %3503 = vmatprep.subr.mxu0 %v2512_v25  ;;  %3471 = vmatpush3.msra.mxu1 %v2495_v24 }
 0x21f   : > { %3504 = vmatpush3.msra.mxu0 %v2512_v25  ;;  %3472 = vmatprep.subr.mxu1 %v2494_v26 }
 0x220   : > { %3505 = vmatprep.subr.mxu0 %v2511_v27  ;;  %3473 = vmatpush3.msra.mxu1 %v2494_v26 }
 0x221   : > { %3506 = vmatpush3.msra.mxu0 %v2511_v27  ;;  %3474 = vmatprep.subr.mxu1 %v2493_v28 }
 0x222   : > { %3507 = vmatprep.subr.mxu0 %v2510_v29  ;;  %3475 = vmatpush3.msra.mxu1 %v2493_v28 }
 0x223   : > { %3508 = vmatpush3.msra.mxu0 %v2510_v29  ;;  %3476 = vmatprep.subr.mxu1 %v2492_v30 }
 0x224   : > { %3509 = vmatprep.subr.mxu0 %v2509_v31  ;;  %3477 = vmatpush3.msra.mxu1 %v2492_v30 }
 0x225   : > { %3510 = vmatpush3.msra.mxu0 %v2509_v31  ;;  %3478 = vmatprep.subr.mxu1 %v2491_v32 }
 0x226   : > { %3511 = vmatprep.subr.mxu0 %v2508_v33  ;;  %3479 = vmatpush3.msra.mxu1 %v2491_v32 }
 0x227   : > { %3512 = vmatpush3.msra.mxu0 %v2508_v33  ;;  %3480 = vmatprep.subr.mxu1 %v2490_v34 }
 0x228   : > { %3513 = vmatprep.subr.mxu0 %v2507_v35  ;;  %3481 = vmatpush3.msra.mxu1 %v2490_v34 }
 0x229   : > { %3514 = vmatpush3.msra.mxu0 %v2507_v35  ;;  %3482 = vmatprep.subr.mxu1 %v2489_v36 }
 0x22a   : > { %3515 = vmatprep.subr.mxu0 %v2506_v37  ;;  %3483 = vmatpush3.msra.mxu1 %v2489_v36 }
 0x22b   : > { %3516 = vmatpush3.msra.mxu0 %v2506_v37  ;;  %3484 = vmatprep.subr.mxu1 %v2488_v38 }
 0x22c   : > { %3517 = vmatprep.subr.mxu0 %v2505_v39  ;;  %3485 = vmatpush3.msra.mxu1 %v2488_v38 }
 0x22d   : > { %3518 = vmatpush3.msra.mxu0 %v2505_v39  ;;  %3486 = vmatprep.subr.mxu1 %v2487_v40  ;;  %v2535_v39 = vld [vmem:[%s3992_s26 + $0x10] sm:$0xff] }
 0x22e   : > { %3519 = vmatprep.subr.mxu0 %v2504_v41  ;;  %3487 = vmatpush3.msra.mxu1 %v2487_v40 }
 0x22f   : > { %3520 = vmatpush3.msra.mxu0 %v2504_v41  ;;  %3488 = vmatprep.subr.mxu1 %v2486_v42 }
 0x230   : > { %3521 = vmatprep.subr.mxu0 %v2503_v43  ;;  %3489 = vmatpush3.msra.mxu1 %v2486_v42  ;;  %v2534_v42 = vld [vmem:[%s3992_s26 + $0x8] sm:$0xff] }
 0x231   : > { %3490 = vmatprep.mubr.f32.mxu1 %v1784_v44  ;;  %3522 = vmatpush3.msra.mxu0 %v2503_v43 }
 0x232   : > { %3491 = vmatmul.mubr.f32.vlgmr.msra.gmra.mxu1 %v1785_v45  ;;  %3523 = vmatprep.subr.mxu0 %v2502_v46 }
 0x233   : > { %3528 = vmatprep.subr.mxu1 %v2533_v47  ;;  %3524 = vmatpush3.msra.mxu0 %v2502_v46 }
 0x234   : > { %3525 = vmatprep.mubr.f32.mxu0 %v1880_v48  ;;  %3529 = vmatpush3.msra.mxu1 %v2533_v47 }
 0x235   : > { %3526 = vmatmul.mubr.f32.vlgmr.msra.gmra.mxu0 %v1881_v49  ;;  %3530 = vmatprep.subr.mxu1 %v2532_v50 }
 0x236   : > { %3560 = vmatprep.mubr.f32.mxu1 %v4656_v63  ;;  %3531 = vmatpush3.msra.mxu1 %v2532_v50  ;;  %v2527_v63 = vld [vmem:[%s5078_s3 + $0x448] sm:$0xff] }
 0x237   : > { %3532 = vmatprep.subr.mxu1 %v2531_v51 }
 0x238   : > { %3533 = vmatpush3.msra.mxu1 %v2531_v51 }
 0x239   : > { %3534 = vmatprep.subr.mxu1 %v2530_v52 }
 0x23a   : > { %3535 = vmatpush3.msra.mxu1 %v2530_v52 }
 0x23b   : > { %3536 = vmatprep.subr.mxu1 %v2529_v53 }
 0x23c   : > { %3537 = vmatpush3.msra.mxu1 %v2529_v53 }
 0x23d   : > { %3538 = vmatprep.subr.mxu1 %v2528_v54 }
 0x23e   : > { %3539 = vmatpush3.msra.mxu1 %v2528_v54 }
 0x23f   : > { %3540 = vmatprep.subr.mxu1 %v2527_v63 }
 0x240   : > { %3541 = vmatpush3.msra.mxu1 %v2527_v63 }
 0x241   : > { %3542 = vmatprep.subr.mxu1 %v2526_v55 }
 0x242   : > { %3543 = vmatpush3.msra.mxu1 %v2526_v55 }
 0x243   : > { %3544 = vmatprep.subr.mxu1 %v2525_v56 }
 0x244   : > { %3545 = vmatpush3.msra.mxu1 %v2525_v56 }
 0x245   : > { %3546 = vmatprep.subr.mxu1 %v2524_v57 }
 0x246   : > { %3547 = vmatpush3.msra.mxu1 %v2524_v57 }
 0x247   : > { %3548 = vmatprep.subr.mxu1 %v2523_v58 }
 0x248   : > { %3549 = vmatpush3.msra.mxu1 %v2523_v58 }
 0x249   : > { %3550 = vmatprep.subr.mxu1 %v2522_v59 }
 0x24a   : > { %3551 = vmatpush3.msra.mxu1 %v2522_v59 }
 0x24b   : > { %3552 = vmatprep.subr.mxu1 %v2521_v60 }
 0x24c   : > { %3553 = vmatpush3.msra.mxu1 %v2521_v60 }
 0x24d   : > { %3554 = vmatprep.subr.mxu1 %v2520_v61 }
 0x24e   : > { %3555 = vmatpush3.msra.mxu1 %v2520_v61 }
 0x24f   : > { %3556 = vmatprep.subr.mxu1 %v2519_v62 }
 0x250   : > { %3557 = vmatpush3.msra.mxu1 %v2519_v62 }
 0x251   : > { %3558 = vmatprep.subr.mxu1 %v2518_v3 }
 0x252   : > { %3559 = vmatpush3.msra.mxu1 %v2518_v3 }
 0x253   : > { %3561 = vmatmul.mubr.f32.vlgmr.msra.gmra.mxu1 %v1977_v4 }
 0x28d   : > { %v3282_v6 = vpop.f32.mrf.mxu1 }
 0x28e   : > { %v3317_v5 = vpop.f32.mrf.mxu0 }
 0x28f   : > { %v1316_v7 = vpop.f32.mrf.mxu1  ;;  %v1397_v9 = vadd.f32 %v3317_v5, %v3282_v6 }
 0x290   : > { %v1391_v8 = vpop.f32.mrf.mxu0 }
 0x291   : > { %v1392_v12 = vadd.f32 %v1391_v8, %v1316_v7 }
 0x2ae   : > { %v3352_v2 = vpop.f32.mrf.mxu1 }
 0x2af   : > { %v1495_v13 = vadd.f32 %v3352_v2, %v1397_v9 }
 0x2b0   : > { %v1485_v10 = vpop.f32.mrf.mxu1 }
 0x2b1   : > { %v3387_v11 = vpop.f32.mrf.mxu0  ;;  %v1494_v15 = vadd.f32 %v1485_v10, %v1392_v12 }
 0x2b2   : > { %v1591_v17 = vadd.f32 %v3387_v11, %v1495_v13 }
 0x2b3   : > { %v1581_v16 = vpop.f32.mrf.mxu0 }
 0x2b4   : > { %v1590_v20 = vadd.f32 %v1581_v16, %v1494_v15 }
 0x2d0   : > { %v3422_v14 = vpop.f32.mrf.mxu1 }
 0x2d1   : > { %v1687_v21 = vadd.f32 %v3422_v14, %v1591_v17 }
 0x2d2   : > { %v1677_v18 = vpop.f32.mrf.mxu1 }
 0x2d3   : > { %v3457_v19 = vpop.f32.mrf.mxu0  ;;  %v1686_v23 = vadd.f32 %v1677_v18, %v1590_v20 }
 0x2d4   : > { %v1783_v25 = vadd.f32 %v3457_v19, %v1687_v21 }
 0x2d5   : > { %v1773_v24 = vpop.f32.mrf.mxu0 }
 0x2d6   : > { %v1782_v28 = vadd.f32 %v1773_v24, %v1686_v23 }
 0x2f2   : > { %v3492_v22 = vpop.f32.mrf.mxu1 }
 0x2f3   : > { %v1879_v29 = vadd.f32 %v3492_v22, %v1783_v25 }
 0x2f4   : > { %v1869_v26 = vpop.f32.mrf.mxu1 }
 0x2f5   : > { %v3527_v27 = vpop.f32.mrf.mxu0  ;;  %v1878_v30 = vadd.f32 %v1869_v26, %v1782_v28 }
 0x2f6   : > { %v1975_v32 = vadd.f32 %v3527_v27, %v1879_v29 }
 0x2f7   : > { %v1965_v31 = vpop.f32.mrf.mxu0 }
 0x2f8   : > { %v1974_v34 = vadd.f32 %v1965_v31, %v1878_v30 }
 0x313   : > { %v3562_v33 = vpop.f32.mrf.mxu1 }
 0x314   : > { %v2071_v35 = vadd.f32 %v3562_v33, %v1975_v32 }
 0x315   : > { %v2061_v36 = vpop.f32.mrf.mxu1 }
 0x316   : > { %v2079_v37 = vmul.f32 %v3838_v0, %v2071_v35  ;;  %v2070_v38 = vadd.f32 %v2061_v36, %v1974_v34 }
 0x318   : > { %v2085_v40 = vadd.f32 %v3843_v1, %v2079_v37  ;;  %v2078_v41 = vmul.f32 %v3838_v0, %v2070_v38 }
 0x31a   : > { %v2087_v43 = vadd.f32 %v2535_v39, %v2085_v40  ;;  %v2084_v44 = vadd.f32 %v3843_v1, %v2078_v41  ;;  %2095 = sbr.rel (%p2538_p2) target bundleno = 801 (0x321), region = 48 }
 0x31c   : > { %v2089_v45 = vmax.f32 %v2087_v43, 0.0  ;;  %v2086_v46 = vadd.f32 %v2534_v42, %v2084_v44 }
 0x31e   : > { %v2088_v47 = vmax.f32 %v2086_v46, 0.0 }
 0x31f   : > { %2097 = vst [vmem:[%s4546_s30 + $0x8] sm:$0xff] %v2089_v45 }
 0x320   : > { %2096 = vst [vmem:[%s4546_s30] sm:$0xff] %v2088_v47 }
 0x321 PF: > { %p2539_p4 = scmp.le.s32.totalorder %s2090_s5, 50 }
 0x323   : > { %2100 = sbr.rel (%p2539_p4) target bundleno = 819 (0x333), region = 52 }
 0x328   : > { %v2101_v0 = vlaneseq  ;;  %v2104_v1 = vstv %s3872_s23 }
 0x32a   : > { %v2102_v48 = vshrl.u32 %v2101_v0, 7 }
 0x32c   : > { %v2105_v49 = vadd.s32 %v2104_v1, %v2102_v48  ;;  %v2103_v50 = vadd.s32 8, %v2102_v48 }
 0x32e   : > { %vm2107_vm10 = vcmp.lt.s32.totalorder %v2105_v49, 50  ;;  %v2106_v51 = vadd.s32 %v2104_v1, %v2103_v50 }
 0x32f   : > { %v2113_v52 = vsel %vm2107_vm10, %v2088_v47, 0.0 }
 0x330   : > { %2115 = vst [vmem:[%s4546_s30] sm:$0xff] %v2113_v52  ;;  %vm2108_vm11 = vcmp.lt.s32.totalorder %v2106_v51, 50 }
 0x331   : > { %v2114_v53 = vsel %vm2108_vm11, %v2089_v45, 0.0 }
 0x332   : > { %2116 = vst [vmem:[%s4546_s30 + $0x8] sm:$0xff] %v2114_v53 }
 0x333 PF: > { %s2541_s26 = sshll.u32 %s3715_s18, 1  ;;  %s2542_s9 = sshll.u32 %s3719_s19, 3 }
 0x334   : > { %s2133_s12 = sshll.u32 %s4546_s30, 4  ;;  %s2130_s23 = sadd.s32 %s2542_s9, %s2541_s26  ;;  %s5015_s12 = int_to_ptr.vmem [resolvable:$true] %s2133_s12 }
 0x335   : > { %s2543_s8 = sshll.u32 %s2130_s23, 7  ;;  %s5089_s6 = sand.u32 1, %s3707_s16  }
 0x336   : > { %s5020_s14 = scalar_lea.hbm %s5079_s4, %s2543_s8  ;;  %s5024_s13 = scalar_lea.sflag [#allocation4], %s5089_s6 }
 0x337   : > { %s3639_s10 = scalar_lea.vmem %s5015_s12, 256  ;;  %s3735_s18 = smov [#allocation3]  }
 0x338   : > { %p3640_p5 = scmp.ne.s32.totalorder %s5015_s12, %s3639_s10  ;;  %s3643_s19 = sshll.u32 %s3735_s18, 4  ;;  %s3644_s19 = int_to_ptr.vmem [resolvable:$false] %s3643_s19 }
 0x339   : > { %s3645_s30 = scalar_lea.vmem %s3644_s19, 512  ;;  %p3646_p9 = scmp.lt.s32.totalorder %s5015_s12, %s3644_s19 }
 0x33a   : > { %p3641_p6 = pnand %p3640_p5, %p3814_p3  ;;  %p3647_p10 = scmp.lt.s32.totalorder %s3645_s30, %s3639_s10 }
 0x33c   : > { %p3642_p7 = pneg %p3641_p6  ;;  %p3648_p11 = por %p3647_p10, %p3646_p9 }
 0x33e   : > { %p3649_p12 = pnand %p3648_p11, %p3642_p7 }
 0x340   : > { %3652 = shalt.err (!%p3649_p12)
}
 0x341   : > { %s3653_s11 = scalar_lea.hbm %s5020_s14, 256  ;;  %s3657_s9 = scalar_lea.hbm %s5079_s4, 2048 }
 0x342   : > { %p3654_p13 = scmp.ne.s32.totalorder %s5020_s14, %s3653_s11  ;;  %p3658_p2 = scmp.lt.s32.totalorder %s5020_s14, %s5079_s4 }
 0x343   : > { %p3659_p4 = scmp.lt.s32.totalorder %s3657_s9, %s3653_s11 }
 0x344   : > { %p3655_p0 = pnand %p3654_p13, %p3814_p3 }
 0x345   : > { %p3660_p5 = por %p3659_p4, %p3658_p2 }
 0x346   : > { %p3656_p1 = pneg %p3655_p0 }
 0x348   : > { %p3661_p6 = pnand %p3660_p5, %p3656_p1 }
 0x34a   : > { %3664 = shalt.err (!%p3661_p6)
}
 0x34b   : > { %s3736_s27 = smov 128   ;;  %s3737_s24 = smov 8  }
 0x34c   : > { %3564 = dma.vmem_to_hbm [thread:$0]  (%p3814_p3), %s5015_s12, 256, %s5020_s14, %s5024_s13, %s3736_s27, %s3736_s27, %s3737_s24  }
 0x34d PF: > { %p3570_p7 = scmp.ge.s32.totalorder %s3731_s22, 2  ;;  %s2148_s6 = sand.u32 1, %s3703_s15  }
 0x34e   : > { %s2149_s10 = scalar_lea.sflag [#allocation4], %s2148_s6 }
 0x34f   : > { %p3567_p9 = pnand %p3570_p7, %p3823_p8 }
 0x351   : > { %p3568_p10 = pneg %p3567_p9 }
 0x353   : > { %3698 = dma.done.wait (%p3568_p10), %s2149_s10, 256  }
 0x354   : > { %3700 = vsyncadd (%p3568_p10), %s2149_s10, 4294967040  ;;  %s17_s22 = sadd.s32 1, %s3731_s22   ;;  %s5090_s28 = sld [smem:[#allocation6_spill]] }
 0x355   : > { %p14_p11 = scmp.ge.s32.totalorder %s17_s22, 10   ;;  %s5091_s15 = smov %s3707_s16 }
 0x356   : > { %s5092_s16 = smov %s3711_s17  ;;  %s5093_s17 = smov %s3832_s7 }
 0x357   : > { %s5094_s18 = smov %s3723_s20  ;;  %s5095_s19 = smov %s3727_s21 }
 0x358   : > { %s5096_s20 = smov %s5099_s25  ;;  %16 = sbr.rel (!%p14_p11) target bundleno = 5 (0x5), region = 112 }
 0x35a   : > { %s5097_s21 = smov %s5090_s28 }
 0x35d   :  { %2154 = vsyncpa [#allocation4], 1 }
 0x35e   :  { %2156 = vsyncpa [#allocation4 + $0x1], 1 }

</bundles_post_ra>
